<compile_context>
chip_gen: v5e
topology: v5e:2x2
jax: 0.10.0
libtpu: 0.0.40
codegen_flags: <defaults>
</compile_context>

<pallas_src>
import functools

import jax
import jax.numpy as jnp
from jax.experimental import pallas as pl
from jax.experimental.pallas import tpu as pltpu


# --------------------------------------------------------------------------- #
# helpers
# --------------------------------------------------------------------------- #
def _round_up(x, m):
    return (x + m - 1) // m * m


def _pick_tile(dim, cap, align):
    """Largest tile <= cap that (after padding dim to `align`) divides it evenly."""
    d = _round_up(dim, align)
    if d <= cap:
        return d
    for t in range(cap, align - 1, -align):
        if d % t == 0:
            return t
    return cap


_VMEM_LIMIT = 48 * 1024 * 1024


# --------------------------------------------------------------------------- #
# Tiled matmul kernel: bf16 MXU operands, f32 VMEM accumulator,
# fused bias-add + dtype-cast epilogue.  out = (x @ w + b).astype(out_dtype)
# --------------------------------------------------------------------------- #
def _matmul_kernel(x_ref, w_ref, b_ref, o_ref, acc_ref):
    @pl.when(pl.program_id(2) == 0)
    def _():
        acc_ref[...] = jnp.zeros_like(acc_ref)

    acc_ref[...] += jnp.dot(x_ref[...].astype(jnp.bfloat16), w_ref[...],
                            preferred_element_type=jnp.float32)

    @pl.when(pl.program_id(2) == pl.num_programs(2) - 1)
    def _():
        o_ref[...] = (acc_ref[...] + b_ref[...]).astype(o_ref.dtype)


def pallas_matmul(x, w, b=None, out_dtype=jnp.bfloat16):
    """x:(M,K) f32/bf16, w:(K,N) bf16, b:(N,) f32 or None -> (M,N) out_dtype."""
    M, K = x.shape
    K2, N = w.shape
    assert K == K2
    if b is None:
        b = jnp.zeros((N,), jnp.float32)

    # tm aligned to 128 (MXU rows) when possible, never below 16 (bf16 sublane pack)
    tm = _pick_tile(M, 512, 128) if M >= 128 else _round_up(M, 16)
    tn = _pick_tile(N, 512, 128)
    tk = _pick_tile(K, 512, 128)
    Mp, Np, Kp = _round_up(M, tm), _round_up(N, tn), _round_up(K, tk)

    # Padding only materializes when shapes are misaligned (no-op for typical SD dims).
    # NO wrapper-level dtype casts: weights arrive bf16, activations are cast in-kernel.
    if (Mp, Kp) != (M, K):
        x = jnp.pad(x, ((0, Mp - M), (0, Kp - K)))
    if (Kp, Np) != (K, N):
        w = jnp.pad(w, ((0, Kp - K), (0, Np - N)))
    bp = b.astype(jnp.float32)
    if Np != N:
        bp = jnp.pad(bp, (0, Np - N))
    bp = bp.reshape(1, Np)

    out = pl.pallas_call(
        _matmul_kernel,
        out_shape=jax.ShapeDtypeStruct((Mp, Np), out_dtype),
        grid=(Mp // tm, Np // tn, Kp // tk),
        in_specs=[
            pl.BlockSpec((tm, tk), lambda i, j, k: (i, k)),
            pl.BlockSpec((tk, tn), lambda i, j, k: (k, j)),
            pl.BlockSpec((1, tn), lambda i, j, k: (0, j)),
        ],
        out_specs=pl.BlockSpec((tm, tn), lambda i, j, k: (i, j)),
        scratch_shapes=[pltpu.VMEM((tm, tn), jnp.float32)],
        compiler_params=pltpu.CompilerParams(
            dimension_semantics=("parallel", "parallel", "arbitrary"),
            vmem_limit_bytes=_VMEM_LIMIT),
    )(x, w, bp)
    if (Mp, Np) != (M, N):
        out = out[:M, :N]
    return out


# --------------------------------------------------------------------------- #
# Multi-head softmax attention kernel
#   - all heads of a (batch, q-tile) live in one block (lane-dense (T,C) tiles)
#   - Q arrives pre-scaled by head_dim**-0.5 (folded into the projection weights)
#   - softmax normalization applied AFTER the PV matmul ((tq,hd) multiply)
#   - per-head results land in a (tq,C) f32 VMEM scratch; one lane-dense bf16 store
# --------------------------------------------------------------------------- #
def _attention_kernel(q_ref, k_ref, v_ref, o_ref, acc_ref, *,
                      num_heads, head_dim, kv_valid):
    q = q_ref[0]                                   # (tq, C) bf16, pre-scaled
    k = k_ref[0]                                   # (S,  C) bf16
    v = v_ref[0]                                   # (S,  C) bf16
    S = k.shape[0]

    if kv_valid < S:                               # static: mask padded key rows
        col = jax.lax.broadcasted_iota(jnp.int32, (1, S), 1)
        key_bias = jnp.where(col < kv_valid, 0.0, -1e30).astype(jnp.float32)
    else:
        key_bias = None

    for h in range(num_heads):                     # static unroll over heads
        lo, hi = h * head_dim, (h + 1) * head_dim
        s = jax.lax.dot_general(q[:, lo:hi], k[:, lo:hi],
                                (((1,), (1,)), ((), ())),
                                preferred_element_type=jnp.float32)
        if key_bias is not None:
            s = s + key_bias
        m = jnp.max(s, axis=-1, keepdims=True)
        p = jnp.exp(s - m)                         # unnormalized probs, f32
        denom = jnp.sum(p, axis=-1, keepdims=True)
        o_h = jnp.dot(p.astype(jnp.bfloat16), v[:, lo:hi],
                      preferred_element_type=jnp.float32)
        acc_ref[:, lo:hi] = o_h * pl.reciprocal(denom, approx=True)

    o_ref[0] = acc_ref[...].astype(o_ref.dtype)    # single lane-dense (tq, C) store


def pallas_attention(q_src, k_src, v_src, *, channels, num_heads, valid_kv_len,
                     q_col=0, k_col=0, v_col=0):
    """Q/K/V are column blocks (width `channels`) q_col/k_col/v_col of their source
    arrays; sources may be the same fused projection tensor (no slice copies)."""
    B, T, _ = q_src.shape
    C = channels
    head_dim = C // num_heads

    # q tile: >=256 rows for MXU occupancy when T allows; keep a multiple of 16.
    if T >= 256:
        Tp = _round_up(T, 256)
        tq = 512 if Tp % 512 == 0 else 256
    else:
        tq = _round_up(T, 16)
        Tp = tq
    # Feed both v7x TensorCores when batch == 1.
    while B == 1 and Tp // tq < 2 and tq >= 256 and Tp % (tq // 2) == 0:
        tq //= 2

    if Tp != T:
        q_pad = jnp.pad(q_src, ((0, 0), (0, Tp - T), (0, 0)))
        if k_src is q_src:
            k_src = q_pad
        if v_src is q_src:
            v_src = q_pad
        q_src = q_pad
    Sp = k_src.shape[1]
    assert v_src.shape[1] == Sp

    out = pl.pallas_call(
        functools.partial(_attention_kernel, num_heads=num_heads,
                          head_dim=head_dim, kv_valid=valid_kv_len),
        out_shape=jax.ShapeDtypeStruct((B, Tp, C), jnp.bfloat16),
        grid=(B, Tp // tq),
        in_specs=[
            pl.BlockSpec((1, tq, C), lambda b, t: (b, t, q_col)),
            pl.BlockSpec((1, Sp, C), lambda b, t: (b, 0, k_col)),
            pl.BlockSpec((1, Sp, C), lambda b, t: (b, 0, v_col)),
        ],
        out_specs=pl.BlockSpec((1, tq, C), lambda b, t: (b, t, 0)),
        scratch_shapes=[pltpu.VMEM((tq, C), jnp.float32)],
        compiler_params=pltpu.CompilerParams(
            dimension_semantics=("parallel", "parallel"),
            vmem_limit_bytes=_VMEM_LIMIT),
    )(q_src, k_src, v_src)
    if Tp != T:
        out = out[:, :T, :]
    return out


# --------------------------------------------------------------------------- #
# Attention module forward (matches PyTorch Attention.forward semantics)
# --------------------------------------------------------------------------- #
def attention_forward(params, hidden_states, encoder_hidden_states=None):
    B, T, C = hidden_states.shape
    nh = params["num_heads"]
    x2d = hidden_states.reshape(B * T, C)
    # column-block BlockSpec slicing needs the channel width to be lane-aligned
    fuse_cols = (C % 128 == 0)

    if encoder_hidden_states is None:
        # fused Q|K|V projection -> bf16 (B, T, 3C); Q columns pre-scaled by hd^-0.5
        qkv = pallas_matmul(x2d, params["w_qkv"]).reshape(B, T, 3 * C)
        if fuse_cols:
            o = pallas_attention(qkv, qkv, qkv, channels=C, num_heads=nh,
                                 valid_kv_len=T, q_col=0, k_col=1, v_col=2)
        else:  # fallback: materialized slices (only when C not a multiple of 128)
            q, k, v = qkv[..., :C], qkv[..., C:2 * C], qkv[..., 2 * C:]
            o = pallas_attention(q, k, v, channels=C, num_heads=nh, valid_kv_len=T)
    else:
        S = encoder_hidden_states.shape[1]
        e2d = encoder_hidden_states.reshape(B * S, -1)
        q = pallas_matmul(x2d, params["wq_s"]).reshape(B, T, C)        # pre-scaled Q
        kv = pallas_matmul(e2d, params["w_kv"]).reshape(B, S, 2 * C)   # fused K|V
        if fuse_cols:
            o = pallas_attention(q, kv, kv, channels=C, num_heads=nh,
                                 valid_kv_len=S, q_col=0, k_col=0, v_col=1)
        else:
            k, v = kv[..., :C], kv[..., C:]
            o = pallas_attention(q, k, v, channels=C, num_heads=nh, valid_kv_len=S)

    # output projection (with bias) back to f32; to_out[1]=Dropout(p=0) is identity.
    out = pallas_matmul(o.reshape(B * T, C), params["wo_b16"], params["bo"],
                        out_dtype=jnp.float32)
    return out.reshape(B, T, C)


# Pure-JAX reference (f32 throughout) for correctness checking.
def attention_reference(params, hidden_states, encoder_hidden_states=None):
    ctx = hidden_states if encoder_hidden_states is None else encoder_hidden_states
    q = hidden_states @ params["wq"]
    k = ctx @ params["wk"]
    v = ctx @ params["wv"]
    B, T, C = q.shape
    S = k.shape[1]
    nh = params["num_heads"]
    hd = params["head_dim"]
    q = q.reshape(B, T, nh, hd).transpose(0, 2, 1, 3)
    k = k.reshape(B, S, nh, hd).transpose(0, 2, 1, 3)
    v = v.reshape(B, S, nh, hd).transpose(0, 2, 1, 3)
    s = jnp.einsum("bhtd,bhsd->bhts", q, k) * hd ** (-0.5)
    p = jax.nn.softmax(s, axis=-1)
    o = jnp.einsum("bhts,bhsd->bhtd", p, v)
    o = o.transpose(0, 2, 1, 3).reshape(B, T, C)
    return o @ params["wo"] + params["bo"]


# --------------------------------------------------------------------------- #
# Deterministic synthetic parameters (bf16 kernel weights built ONCE here)
# --------------------------------------------------------------------------- #
def init_attention_params(key, inner_dim, cross_attention_dim=None, num_heads=None):
    if num_heads is None:
        num_heads = inner_dim // 64
    head_dim = inner_dim // num_heads
    cross = inner_dim if cross_attention_dim is None else cross_attention_dim
    ks = jax.random.split(key, 5)
    std = 0.05
    wq = jax.random.normal(ks[0], (inner_dim, inner_dim), jnp.float32) * std
    wk = jax.random.normal(ks[1], (cross, inner_dim), jnp.float32) * std
    wv = jax.random.normal(ks[2], (cross, inner_dim), jnp.float32) * std
    wo = jax.random.normal(ks[3], (inner_dim, inner_dim), jnp.float32) * std
    bo = jax.random.normal(ks[4], (inner_dim,), jnp.float32) * std
    scale = head_dim ** (-0.5)
    params = dict(
        num_heads=num_heads, head_dim=head_dim,
        # f32 reference weights
        wq=wq, wk=wk, wv=wv, wo=wo, bo=bo,
        # kernel weights: bf16, converted once; Q columns pre-scaled by hd^-0.5
        wq_s=(wq * scale).astype(jnp.bfloat16),
        w_kv=jnp.concatenate([wk, wv], axis=1).astype(jnp.bfloat16),
        wo_b16=wo.astype(jnp.bfloat16),
    )
    if cross == inner_dim:
        params["w_qkv"] = jnp.concatenate([wq * scale, wk, wv],
                                          axis=1).astype(jnp.bfloat16)
    return params


# --------------------------------------------------------------------------- #
# Main
# --------------------------------------------------------------------------- #
if __name__ == "__main__":
    B, T = 2, 64                  # e.g. 8x8 spatial tokens
    inner_dim = 128               # -> head_dim=64, num_heads=2 (module default)
    cross_dim, S_enc = 256, 16

    kp1, kp2, ki1, ki2 = jax.random.split(jax.random.PRNGKey(0), 4)
    self_params = init_attention_params(kp1, inner_dim)
    cross_params = init_attention_params(kp2, inner_dim, cross_attention_dim=cross_dim)

    hidden = jax.random.normal(ki1, (B, T, inner_dim), jnp.float32)
    encoder = jax.random.normal(ki2, (B, S_enc, cross_dim), jnp.float32)

    self_attn = jax.jit(lambda h: attention_forward(self_params, h))
    cross_attn = jax.jit(lambda h, e: attention_forward(cross_params, h, e))

    out_self = jax.block_until_ready(self_attn(hidden))
    out_cross = jax.block_until_ready(cross_attn(hidden, encoder))

    assert out_self.shape == (B, T, inner_dim), out_self.shape
    assert out_cross.shape == (B, T, inner_dim), out_cross.shape
    assert bool(jnp.all(jnp.isfinite(out_self)))
    assert bool(jnp.all(jnp.isfinite(out_cross)))

    ref_self = attention_reference(self_params, hidden)
    ref_cross = attention_reference(cross_params, hidden, encoder)
    err_s = float(jnp.max(jnp.abs(out_self - ref_self)))
    err_c = float(jnp.max(jnp.abs(out_cross - ref_cross)))
    assert err_s < 5e-2, f"self-attn max abs err {err_s}"
    assert err_c < 5e-2, f"cross-attn max abs err {err_c}"

    print("KERNEL_OK")
</pallas_src>

<mosaic_0001>
module attributes {stable_mosaic.version = 11 : i64} {
  func.func @_attention_kernel(%arg0: i32, %arg1: i32, %arg2: memref<1x64x128xbf16, #tpu.memory_space<vmem>>, %arg3: memref<1x64x128xbf16, #tpu.memory_space<vmem>>, %arg4: memref<1x64x128xbf16, #tpu.memory_space<vmem>>, %arg5: memref<1x64x128xbf16, #tpu.memory_space<vmem>>, %arg6: memref<64x128xf32, #tpu.memory_space<vmem>>) attributes {dimension_semantics = [#tpu.dimension_semantics<parallel>, #tpu.dimension_semantics<parallel>], iteration_bounds = array<i64: 2, 1>, scalar_prefetch = 0 : i64, scratch_operands = 1 : i64, tpu.core_type = #tpu.core_type<tc>, window_params = [{transform_indices = @transform_0, window_bounds = array<i64: 1, 64, 128>}, {transform_indices = @transform_1, window_bounds = array<i64: 1, 64, 128>}, {transform_indices = @transform_2, window_bounds = array<i64: 1, 64, 128>}, {transform_indices = @transform_3, window_bounds = array<i64: 1, 64, 128>}]} {
    %c0 = arith.constant 0 : index
    %c0_0 = arith.constant 0 : index
    %c0_1 = arith.constant 0 : index
    %0 = vector.load %arg2[%c0, %c0_0, %c0_1] : memref<1x64x128xbf16, #tpu.memory_space<vmem>>, vector<1x64x128xbf16>
    %1 = vector.shape_cast %0 : vector<1x64x128xbf16> to vector<64x128xbf16>
    %c0_2 = arith.constant 0 : index
    %c0_3 = arith.constant 0 : index
    %c0_4 = arith.constant 0 : index
    %2 = vector.load %arg3[%c0_2, %c0_3, %c0_4] : memref<1x64x128xbf16, #tpu.memory_space<vmem>>, vector<1x64x128xbf16>
    %3 = vector.shape_cast %2 : vector<1x64x128xbf16> to vector<64x128xbf16>
    %c0_5 = arith.constant 0 : index
    %c0_6 = arith.constant 0 : index
    %c0_7 = arith.constant 0 : index
    %4 = vector.load %arg4[%c0_5, %c0_6, %c0_7] : memref<1x64x128xbf16, #tpu.memory_space<vmem>>, vector<1x64x128xbf16>
    %5 = vector.shape_cast %4 : vector<1x64x128xbf16> to vector<64x128xbf16>
    %6 = vector.extract_strided_slice %1 {offsets = [0, 0], sizes = [64, 64], strides = [1, 1]} : vector<64x128xbf16> to vector<64x64xbf16>
    %7 = vector.extract_strided_slice %3 {offsets = [0, 0], sizes = [64, 64], strides = [1, 1]} : vector<64x128xbf16> to vector<64x64xbf16>
    %cst = arith.constant dense<0.000000e+00> : vector<64x64xf32>
    %8 = tpu.matmul %6, %7, %cst {dimension_numbers = #tpu.dot_dimension_numbers<[1], [1], [0], [0], [0, 0, 1, 0], [], []>} : vector<64x64xbf16>, vector<64x64xbf16>, vector<64x64xf32> -> vector<64x64xf32>
    %cst_8 = arith.constant dense<0xFF800000> : vector<64xf32>
    %9 = vector.multi_reduction <maximumf>, %8, %cst_8 [1] : vector<64x64xf32> to vector<64xf32>
    %10 = vector.shape_cast %9 : vector<64xf32> to vector<64x1xf32>
    %11 = vector.broadcast %10 : vector<64x1xf32> to vector<64x64xf32>
    %12 = arith.subf %8, %11 : vector<64x64xf32>
    %13 = math.exp %12 : vector<64x64xf32>
    %cst_9 = arith.constant dense<0.000000e+00> : vector<64xf32>
    %14 = vector.multi_reduction <add>, %13, %cst_9 [1] : vector<64x64xf32> to vector<64xf32>
    %15 = vector.shape_cast %14 : vector<64xf32> to vector<64x1xf32>
    %16 = arith.truncf %13 : vector<64x64xf32> to vector<64x64xbf16>
    %17 = vector.extract_strided_slice %5 {offsets = [0, 0], sizes = [64, 64], strides = [1, 1]} : vector<64x128xbf16> to vector<64x64xbf16>
    %cst_10 = arith.constant dense<0.000000e+00> : vector<64x64xf32>
    %18 = tpu.matmul %16, %17, %cst_10 {dimension_numbers = #tpu.dot_dimension_numbers<[1], [0], [0], [1], [0, 0, 1, 1], [], []>} : vector<64x64xbf16>, vector<64x64xbf16>, vector<64x64xf32> -> vector<64x64xf32>
    %19 = tpu.reciprocal %15 {approx = true} : vector<64x1xf32> -> vector<64x1xf32>
    %20 = vector.broadcast %19 : vector<64x1xf32> to vector<64x64xf32>
    %21 = arith.mulf %18, %20 : vector<64x64xf32>
    %c0_11 = arith.constant 0 : index
    %c0_12 = arith.constant 0 : index
    %22 = vector.load %arg6[%c0_11, %c0_12] : memref<64x128xf32, #tpu.memory_space<vmem>>, vector<64x64xf32>
    tpu.vector_store %arg6[%c0_11, %c0_12], %21 {strides = array<i32>} : memref<64x128xf32, #tpu.memory_space<vmem>>, vector<64x64xf32>,
    %23 = vector.extract_strided_slice %1 {offsets = [0, 64], sizes = [64, 64], strides = [1, 1]} : vector<64x128xbf16> to vector<64x64xbf16>
    %24 = vector.extract_strided_slice %3 {offsets = [0, 64], sizes = [64, 64], strides = [1, 1]} : vector<64x128xbf16> to vector<64x64xbf16>
    %cst_13 = arith.constant dense<0.000000e+00> : vector<64x64xf32>
    %25 = tpu.matmul %23, %24, %cst_13 {dimension_numbers = #tpu.dot_dimension_numbers<[1], [1], [0], [0], [0, 0, 1, 0], [], []>} : vector<64x64xbf16>, vector<64x64xbf16>, vector<64x64xf32> -> vector<64x64xf32>
    %cst_14 = arith.constant dense<0xFF800000> : vector<64xf32>
    %26 = vector.multi_reduction <maximumf>, %25, %cst_14 [1] : vector<64x64xf32> to vector<64xf32>
    %27 = vector.shape_cast %26 : vector<64xf32> to vector<64x1xf32>
    %28 = vector.broadcast %27 : vector<64x1xf32> to vector<64x64xf32>
    %29 = arith.subf %25, %28 : vector<64x64xf32>
    %30 = math.exp %29 : vector<64x64xf32>
    %cst_15 = arith.constant dense<0.000000e+00> : vector<64xf32>
    %31 = vector.multi_reduction <add>, %30, %cst_15 [1] : vector<64x64xf32> to vector<64xf32>
    %32 = vector.shape_cast %31 : vector<64xf32> to vector<64x1xf32>
    %33 = arith.truncf %30 : vector<64x64xf32> to vector<64x64xbf16>
    %34 = vector.extract_strided_slice %5 {offsets = [0, 64], sizes = [64, 64], strides = [1, 1]} : vector<64x128xbf16> to vector<64x64xbf16>
    %cst_16 = arith.constant dense<0.000000e+00> : vector<64x64xf32>
    %35 = tpu.matmul %33, %34, %cst_16 {dimension_numbers = #tpu.dot_dimension_numbers<[1], [0], [0], [1], [0, 0, 1, 1], [], []>} : vector<64x64xbf16>, vector<64x64xbf16>, vector<64x64xf32> -> vector<64x64xf32>
    %36 = tpu.reciprocal %32 {approx = true} : vector<64x1xf32> -> vector<64x1xf32>
    %37 = vector.broadcast %36 : vector<64x1xf32> to vector<64x64xf32>
    %38 = arith.mulf %35, %37 : vector<64x64xf32>
    %c0_17 = arith.constant 0 : index
    %c64 = arith.constant 64 : index
    %39 = vector.load %arg6[%c0_17, %c64] : memref<64x128xf32, #tpu.memory_space<vmem>>, vector<64x64xf32>
    tpu.vector_store %arg6[%c0_17, %c64], %38 {strides = array<i32>} : memref<64x128xf32, #tpu.memory_space<vmem>>, vector<64x64xf32>,
    %c0_18 = arith.constant 0 : index
    %c0_19 = arith.constant 0 : index
    %40 = vector.load %arg6[%c0_18, %c0_19] : memref<64x128xf32, #tpu.memory_space<vmem>>, vector<64x128xf32>
    %41 = arith.truncf %40 : vector<64x128xf32> to vector<64x128xbf16>
    %c0_20 = arith.constant 0 : index
    %c0_21 = arith.constant 0 : index
    %c0_22 = arith.constant 0 : index
    %42 = vector.load %arg5[%c0_20, %c0_21, %c0_22] : memref<1x64x128xbf16, #tpu.memory_space<vmem>>, vector<1x64x128xbf16>
    %43 = vector.shape_cast %42 : vector<1x64x128xbf16> to vector<64x128xbf16>
    %44 = vector.shape_cast %41 : vector<64x128xbf16> to vector<1x64x128xbf16>
    tpu.vector_store %arg5[%c0_20, %c0_21, %c0_22], %44 {strides = array<i32>} : memref<1x64x128xbf16, #tpu.memory_space<vmem>>, vector<1x64x128xbf16>,
    return
  }
  func.func @transform_0(%arg0: i32, %arg1: i32) -> (i32, i32, i32) {
    %c0_i32 = arith.constant 0 : i32
    %c0_i32_0 = arith.constant 0 : i32
    return %arg0, %arg1, %c0_i32 : i32, i32, i32
  }
  func.func @transform_1(%arg0: i32, %arg1: i32) -> (i32, i32, i32) {
    %c0_i32 = arith.constant 0 : i32
    %c1_i32 = arith.constant 1 : i32
    %c0_i32_0 = arith.constant 0 : i32
    return %arg0, %c0_i32, %c1_i32 : i32, i32, i32
  }
  func.func @transform_2(%arg0: i32, %arg1: i32) -> (i32, i32, i32) {
    %c0_i32 = arith.constant 0 : i32
    %c2_i32 = arith.constant 2 : i32
    %c0_i32_0 = arith.constant 0 : i32
    return %arg0, %c0_i32, %c2_i32 : i32, i32, i32
  }
  func.func @transform_3(%arg0: i32, %arg1: i32) -> (i32, i32, i32) {
    %c0_i32 = arith.constant 0 : i32
    %c0_i32_0 = arith.constant 0 : i32
    return %arg0, %arg1, %c0_i32 : i32, i32, i32
  }
}

module attributes {stable_mosaic.version = 11 : i64} {
  func.func @_matmul_kernel(%arg0: i32, %arg1: i32, %arg2: i32, %arg3: memref<128x128xf32, #tpu.memory_space<vmem>>, %arg4: memref<128x384xbf16, #tpu.memory_space<vmem>>, %arg5: memref<1x384xf32, #tpu.memory_space<vmem>>, %arg6: memref<128x384xbf16, #tpu.memory_space<vmem>>, %arg7: memref<128x384xf32, #tpu.memory_space<vmem>>) attributes {dimension_semantics = [#tpu.dimension_semantics<parallel>, #tpu.dimension_semantics<parallel>, #tpu.dimension_semantics<arbitrary>], iteration_bounds = array<i64: 1, 1, 1>, scalar_prefetch = 0 : i64, scratch_operands = 1 : i64, tpu.core_type = #tpu.core_type<tc>, window_params = [{transform_indices = @transform_0, window_bounds = array<i64: 128, 128>}, {transform_indices = @transform_1, window_bounds = array<i64: 128, 384>}, {transform_indices = @transform_2, window_bounds = array<i64: 1, 384>}, {transform_indices = @transform_3, window_bounds = array<i64: 128, 384>}]} {
    %c0_i32 = arith.constant 0 : i32
    %0 = arith.cmpi eq, %arg2, %c0_i32 : i32
    %1 = arith.extui %0 : i1 to i32
    %c0_i32_0 = arith.constant 0 : i32
    %2 = arith.cmpi ne, %1, %c0_i32_0 : i32
    scf.if %2 {
      %cst_10 = arith.constant 0.000000e+00 : f32
      %13 = vector.broadcast %cst_10 : f32 to vector<128x384xf32>
      %c0_11 = arith.constant 0 : index
      %c0_12 = arith.constant 0 : index
      %14 = vector.load %arg7[%c0_11, %c0_12] : memref<128x384xf32, #tpu.memory_space<vmem>>, vector<128x384xf32>
      tpu.vector_store %arg7[%c0_11, %c0_12], %13 {strides = array<i32>} : memref<128x384xf32, #tpu.memory_space<vmem>>, vector<128x384xf32>,
    } else {
    }
    %c0 = arith.constant 0 : index
    %c0_1 = arith.constant 0 : index
    %3 = vector.load %arg7[%c0, %c0_1] : memref<128x384xf32, #tpu.memory_space<vmem>>, vector<128x384xf32>
    %c0_2 = arith.constant 0 : index
    %c0_3 = arith.constant 0 : index
    %4 = vector.load %arg3[%c0_2, %c0_3] : memref<128x128xf32, #tpu.memory_space<vmem>>, vector<128x128xf32>
    %5 = arith.truncf %4 : vector<128x128xf32> to vector<128x128xbf16>
    %c0_4 = arith.constant 0 : index
    %c0_5 = arith.constant 0 : index
    %6 = vector.load %arg4[%c0_4, %c0_5] : memref<128x384xbf16, #tpu.memory_space<vmem>>, vector<128x384xbf16>
    %cst = arith.constant dense<0.000000e+00> : vector<128x384xf32>
    %7 = tpu.matmul %5, %6, %cst {dimension_numbers = #tpu.dot_dimension_numbers<[1], [0], [0], [1], [0, 0, 1, 1], [], []>} : vector<128x128xbf16>, vector<128x384xbf16>, vector<128x384xf32> -> vector<128x384xf32>
    %8 = arith.addf %3, %7 : vector<128x384xf32>
    %c0_6 = arith.constant 0 : index
    %c0_7 = arith.constant 0 : index
    %9 = vector.load %arg7[%c0_6, %c0_7] : memref<128x384xf32, #tpu.memory_space<vmem>>, vector<128x384xf32>
    tpu.vector_store %arg7[%c0_6, %c0_7], %8 {strides = array<i32>} : memref<128x384xf32, #tpu.memory_space<vmem>>, vector<128x384xf32>,
    %c0_i32_8 = arith.constant 0 : i32
    %10 = arith.cmpi eq, %arg2, %c0_i32_8 : i32
    %11 = arith.extui %10 : i1 to i32
    %c0_i32_9 = arith.constant 0 : i32
    %12 = arith.cmpi ne, %11, %c0_i32_9 : i32
    scf.if %12 {
      %c0_10 = arith.constant 0 : index
      %c0_11 = arith.constant 0 : index
      %13 = vector.load %arg7[%c0_10, %c0_11] : memref<128x384xf32, #tpu.memory_space<vmem>>, vector<128x384xf32>
      %c0_12 = arith.constant 0 : index
      %c0_13 = arith.constant 0 : index
      %14 = vector.load %arg5[%c0_12, %c0_13] : memref<1x384xf32, #tpu.memory_space<vmem>>, vector<1x384xf32>
      %15 = vector.broadcast %14 : vector<1x384xf32> to vector<128x384xf32>
      %16 = arith.addf %13, %15 : vector<128x384xf32>
      %17 = arith.truncf %16 : vector<128x384xf32> to vector<128x384xbf16>
      %c0_14 = arith.constant 0 : index
      %c0_15 = arith.constant 0 : index
      %18 = vector.load %arg6[%c0_14, %c0_15] : memref<128x384xbf16, #tpu.memory_space<vmem>>, vector<128x384xbf16>
      tpu.vector_store %arg6[%c0_14, %c0_15], %17 {strides = array<i32>} : memref<128x384xbf16, #tpu.memory_space<vmem>>, vector<128x384xbf16>,
    } else {
    }
    return
  }
  func.func @transform_0(%arg0: i32, %arg1: i32, %arg2: i32) -> (i32, i32) {
    %c0_i32 = arith.constant 0 : i32
    return %arg0, %arg2 : i32, i32
  }
  func.func @transform_1(%arg0: i32, %arg1: i32, %arg2: i32) -> (i32, i32) {
    %c0_i32 = arith.constant 0 : i32
    return %arg2, %arg1 : i32, i32
  }
  func.func @transform_2(%arg0: i32, %arg1: i32, %arg2: i32) -> (i32, i32) {
    %c0_i32 = arith.constant 0 : i32
    %c0_i32_0 = arith.constant 0 : i32
    return %c0_i32, %arg1 : i32, i32
  }
  func.func @transform_3(%arg0: i32, %arg1: i32, %arg2: i32) -> (i32, i32) {
    %c0_i32 = arith.constant 0 : i32
    return %arg0, %arg1 : i32, i32
  }
}

module attributes {stable_mosaic.version = 11 : i64} {
  func.func @_matmul_kernel(%arg0: i32, %arg1: i32, %arg2: i32, %arg3: memref<128x128xbf16, #tpu.memory_space<vmem>>, %arg4: memref<128x128xbf16, #tpu.memory_space<vmem>>, %arg5: memref<1x128xf32, #tpu.memory_space<vmem>>, %arg6: memref<128x128xf32, #tpu.memory_space<vmem>>, %arg7: memref<128x128xf32, #tpu.memory_space<vmem>>) attributes {dimension_semantics = [#tpu.dimension_semantics<parallel>, #tpu.dimension_semantics<parallel>, #tpu.dimension_semantics<arbitrary>], iteration_bounds = array<i64: 1, 1, 1>, scalar_prefetch = 0 : i64, scratch_operands = 1 : i64, tpu.core_type = #tpu.core_type<tc>, window_params = [{transform_indices = @transform_0, window_bounds = array<i64: 128, 128>}, {transform_indices = @transform_1, window_bounds = array<i64: 128, 128>}, {transform_indices = @transform_2, window_bounds = array<i64: 1, 128>}, {transform_indices = @transform_3, window_bounds = array<i64: 128, 128>}]} {
    %c0_i32 = arith.constant 0 : i32
    %0 = arith.cmpi eq, %arg2, %c0_i32 : i32
    %1 = arith.extui %0 : i1 to i32
    %c0_i32_0 = arith.constant 0 : i32
    %2 = arith.cmpi ne, %1, %c0_i32_0 : i32
    scf.if %2 {
      %cst_10 = arith.constant 0.000000e+00 : f32
      %12 = vector.broadcast %cst_10 : f32 to vector<128x128xf32>
      %c0_11 = arith.constant 0 : index
      %c0_12 = arith.constant 0 : index
      %13 = vector.load %arg7[%c0_11, %c0_12] : memref<128x128xf32, #tpu.memory_space<vmem>>, vector<128x128xf32>
      tpu.vector_store %arg7[%c0_11, %c0_12], %12 {strides = array<i32>} : memref<128x128xf32, #tpu.memory_space<vmem>>, vector<128x128xf32>,
    } else {
    }
    %c0 = arith.constant 0 : index
    %c0_1 = arith.constant 0 : index
    %3 = vector.load %arg7[%c0, %c0_1] : memref<128x128xf32, #tpu.memory_space<vmem>>, vector<128x128xf32>
    %c0_2 = arith.constant 0 : index
    %c0_3 = arith.constant 0 : index
    %4 = vector.load %arg3[%c0_2, %c0_3] : memref<128x128xbf16, #tpu.memory_space<vmem>>, vector<128x128xbf16>
    %c0_4 = arith.constant 0 : index
    %c0_5 = arith.constant 0 : index
    %5 = vector.load %arg4[%c0_4, %c0_5] : memref<128x128xbf16, #tpu.memory_space<vmem>>, vector<128x128xbf16>
    %cst = arith.constant dense<0.000000e+00> : vector<128x128xf32>
    %6 = tpu.matmul %4, %5, %cst {dimension_numbers = #tpu.dot_dimension_numbers<[1], [0], [0], [1], [0, 0, 1, 1], [], []>} : vector<128x128xbf16>, vector<128x128xbf16>, vector<128x128xf32> -> vector<128x128xf32>
    %7 = arith.addf %3, %6 : vector<128x128xf32>
    %c0_6 = arith.constant 0 : index
    %c0_7 = arith.constant 0 : index
    %8 = vector.load %arg7[%c0_6, %c0_7] : memref<128x128xf32, #tpu.memory_space<vmem>>, vector<128x128xf32>
    tpu.vector_store %arg7[%c0_6, %c0_7], %7 {strides = array<i32>} : memref<128x128xf32, #tpu.memory_space<vmem>>, vector<128x128xf32>,
    %c0_i32_8 = arith.constant 0 : i32
    %9 = arith.cmpi eq, %arg2, %c0_i32_8 : i32
    %10 = arith.extui %9 : i1 to i32
    %c0_i32_9 = arith.constant 0 : i32
    %11 = arith.cmpi ne, %10, %c0_i32_9 : i32
    scf.if %11 {
      %c0_10 = arith.constant 0 : index
      %c0_11 = arith.constant 0 : index
      %12 = vector.load %arg7[%c0_10, %c0_11] : memref<128x128xf32, #tpu.memory_space<vmem>>, vector<128x128xf32>
      %c0_12 = arith.constant 0 : index
      %c0_13 = arith.constant 0 : index
      %13 = vector.load %arg5[%c0_12, %c0_13] : memref<1x128xf32, #tpu.memory_space<vmem>>, vector<1x128xf32>
      %14 = vector.broadcast %13 : vector<1x128xf32> to vector<128x128xf32>
      %15 = arith.addf %12, %14 : vector<128x128xf32>
      %c0_14 = arith.constant 0 : index
      %c0_15 = arith.constant 0 : index
      %16 = vector.load %arg6[%c0_14, %c0_15] : memref<128x128xf32, #tpu.memory_space<vmem>>, vector<128x128xf32>
      tpu.vector_store %arg6[%c0_14, %c0_15], %15 {strides = array<i32>} : memref<128x128xf32, #tpu.memory_space<vmem>>, vector<128x128xf32>,
    } else {
    }
    return
  }
  func.func @transform_0(%arg0: i32, %arg1: i32, %arg2: i32) -> (i32, i32) {
    %c0_i32 = arith.constant 0 : i32
    return %arg0, %arg2 : i32, i32
  }
  func.func @transform_1(%arg0: i32, %arg1: i32, %arg2: i32) -> (i32, i32) {
    %c0_i32 = arith.constant 0 : i32
    return %arg2, %arg1 : i32, i32
  }
  func.func @transform_2(%arg0: i32, %arg1: i32, %arg2: i32) -> (i32, i32) {
    %c0_i32 = arith.constant 0 : i32
    %c0_i32_0 = arith.constant 0 : i32
    return %c0_i32, %arg1 : i32, i32
  }
  func.func @transform_3(%arg0: i32, %arg1: i32, %arg2: i32) -> (i32, i32) {
    %c0_i32 = arith.constant 0 : i32
    return %arg0, %arg1 : i32, i32
  }
}

</mosaic_0001>

<bundles_post_ra>
// kernel: _lambda_.5
= control target key start
LH: loop header
LB: loop body
LE: loop exit
PB: predicated region body
PF: predicated region fallthrough
CT: control target
= control target key end

     0   :  { %8 = vsyncpa [#allocation4], 0  ;;  %s572_s0 = inlined_call_operand.vmem [shape: bf16[128,128], index: 0, kind: input, shape index: {}]   ;;  %s573_s1 = inlined_call_operand.hbm [shape: bf16[128,128], index: 1, kind: input, shape index: {}]   ;;  %s574_s2 = inlined_call_operand.vmem [shape: f32[1,128], index: 2, kind: input, shape index: {}]   ;;  %s575_s3 = inlined_call_operand.hbm [shape: f32[128,128], index: 3, kind: output, shape index: {}]  }
   0x1   :  { %9 = vsyncpa [#allocation5], 0  ;;  %s16_s14 = sshll.u32 %s573_s1, 4  ;;  %s513_s15 = smov [#allocation3]   ;;  %s17_s14 = int_to_ptr.hbm [resolvable:$true] %s16_s14 }
   0x2   :  { %s18_s16 = sshll.u32 %s513_s15, 4  ;;  %s514_s17 = smov 64   ;;  %s19_s16 = int_to_ptr.vmem [resolvable:$true] %s18_s16 }
   0x3   :  { %s515_s18 = smov 4  }
   0x4   :  { %24 = dma.hbm_to_vmem [thread:$0]  %s17_s14, 1024, %s19_s16, [#allocation4], %s514_s17, %s514_s17, %s515_s18  }
   0x5   :  { %509 = dma.done.wait [#allocation4], 1024  }
   0x6   :  { %510 = vsyncadd [#allocation4], 4294966272  ;;  %v429_v0 = vld [vmem:[#allocation3 + $0x38] sm:$0xff]  ;;  %v428_v1 = vld [vmem:[#allocation3 + $0x30] sm:$0xff]  ;;  %s337_s11 = sshll.u32 %s575_s3, 4  ;;  %s517_s12 = smov 128   ;;  %s338_s11 = int_to_ptr.hbm [resolvable:$true] %s337_s11 }
   0x7   :  { %195 = vmatpush.bf16.msra.mxu0 %v429_v0  ;;  %430 = vmatpush.bf16.msra.mxu1 %v429_v0  ;;  %v427_v2 = vld [vmem:[#allocation3 + $0x28] sm:$0xff]  ;;  %v426_v3 = vld [vmem:[#allocation3 + $0x20] sm:$0xff]  ;;  %v425_v4 = vld [vmem:[#allocation3 + $0x18] sm:$0xff]  ;;  %s518_s13 = smov 8  }
   0x8   :  { %431 = vmatpush.bf16.msra.mxu2 %v429_v0  ;;  %432 = vmatpush.bf16.msra.mxu3 %v429_v0  ;;  %v424_v5 = vld [vmem:[#allocation3 + $0x10] sm:$0xff]  ;;  %v423_v6 = vld [vmem:[#allocation3 + $0x8] sm:$0xff]  ;;  %v422_v7 = vld [vmem:[#allocation3] sm:$0xff] }
   0x9   :  { %v414_v8 = vld [vmem:[%s572_s0] sm:$0xff]  ;;  %v416_v9 = vld [vmem:[%s572_s0 + $0x10] sm:$0xff]  ;;  %v415_v12 = vld [vmem:[%s572_s0 + $0x8] sm:$0xff] }
   0xa   :  { %v418_v10 = vld [vmem:[%s572_s0 + $0x20] sm:$0xff]  ;;  %v420_v11 = vld [vmem:[%s572_s0 + $0x30] sm:$0xff]  ;;  %v417_v13 = vld [vmem:[%s572_s0 + $0x18] sm:$0xff] }
   0xb   :  { %196 = vmatpush.bf16.msra.mxu0 %v428_v1  ;;  %433 = vmatpush.bf16.msra.mxu1 %v428_v1  ;;  %v419_v14 = vld [vmem:[%s572_s0 + $0x28] sm:$0xff]  ;;  %v421_v15 = vld [vmem:[%s572_s0 + $0x38] sm:$0xff]  ;;  %v460_v16 = vld [vmem:[%s574_s2] ss:$0 sm:$0xff]  ;;  %s516_s0 = smov [#allocation6]  }
   0xc   :  { %434 = vmatpush.bf16.msra.mxu2 %v428_v1  ;;  %435 = vmatpush.bf16.msra.mxu3 %v428_v1  ;;  %s335_s2 = sshll.u32 %s516_s0, 4  ;;  %s336_s2 = int_to_ptr.vmem [resolvable:$true] %s335_s2 }
   0xf   :  { %197 = vmatpush.bf16.msra.mxu0 %v427_v2  ;;  %436 = vmatpush.bf16.msra.mxu1 %v427_v2 }
  0x10   :  { %437 = vmatpush.bf16.msra.mxu2 %v427_v2  ;;  %438 = vmatpush.bf16.msra.mxu3 %v427_v2 }
  0x13   :  { %198 = vmatpush.bf16.msra.mxu0 %v426_v3  ;;  %439 = vmatpush.bf16.msra.mxu1 %v426_v3 }
  0x14   :  { %440 = vmatpush.bf16.msra.mxu2 %v426_v3  ;;  %441 = vmatpush.bf16.msra.mxu3 %v426_v3 }
  0x17   :  { %199 = vmatpush.bf16.msra.mxu0 %v425_v4  ;;  %442 = vmatpush.bf16.msra.mxu1 %v425_v4 }
  0x18   :  { %443 = vmatpush.bf16.msra.mxu2 %v425_v4  ;;  %444 = vmatpush.bf16.msra.mxu3 %v425_v4 }
  0x1b   :  { %200 = vmatpush.bf16.msra.mxu0 %v424_v5  ;;  %445 = vmatpush.bf16.msra.mxu1 %v424_v5 }
  0x1c   :  { %446 = vmatpush.bf16.msra.mxu2 %v424_v5  ;;  %447 = vmatpush.bf16.msra.mxu3 %v424_v5 }
  0x1f   :  { %201 = vmatpush.bf16.msra.mxu0 %v423_v6  ;;  %448 = vmatpush.bf16.msra.mxu1 %v423_v6 }
  0x20   :  { %449 = vmatpush.bf16.msra.mxu2 %v423_v6  ;;  %450 = vmatpush.bf16.msra.mxu3 %v423_v6 }
  0x23   :  { %202 = vmatpush.bf16.msra.mxu0 %v422_v7  ;;  %451 = vmatpush.bf16.msra.mxu1 %v422_v7 }
  0x24   :  { %452 = vmatpush.bf16.msra.mxu2 %v422_v7  ;;  %453 = vmatpush.bf16.msra.mxu3 %v422_v7 }
  0x26   :  { %203 = vmatmul.bf16.vlgmr.msra.gmra.mxu0 %v414_v8  ;;  %213 = vmatmul.bf16.vlgmr.msra.gmra.mxu1 %v416_v9 }
  0x27   :  { %223 = vmatmul.bf16.vlgmr.msra.gmra.mxu2 %v418_v10  ;;  %233 = vmatmul.bf16.vlgmr.msra.gmra.mxu3 %v420_v11 }
  0x36   :  { %208 = vmatmul.bf16.gmra.mxu0 %v415_v12  ;;  %218 = vmatmul.bf16.gmra.mxu1 %v417_v13 }
  0x37   :  { %228 = vmatmul.bf16.gmra.mxu2 %v419_v14  ;;  %238 = vmatmul.bf16.gmra.mxu3 %v421_v15 }
  0xa3   :  { %v204_v17 = vpop.f32.mrf.mxu0  ;;  %v214_v18 = vpop.f32.mrf.mxu1 }
  0xa4   :  { %v299_v19 = vadd.f32 %v460_v16, %v204_v17  ;;  %v303_v20 = vadd.f32 %v460_v16, %v214_v18 }
  0xa6   :  { %315 = vst [vmem:[#allocation6] sm:$0xff] %v299_v19 }
  0xa7   :  { %319 = vst [vmem:[#allocation6 + $0x20] sm:$0xff] %v303_v20 }
  0xaa   :  { %v224_v21 = vpop.f32.mrf.mxu2  ;;  %v234_v22 = vpop.f32.mrf.mxu3 }
  0xab   :  { %v307_v23 = vadd.f32 %v460_v16, %v224_v21  ;;  %v311_v24 = vadd.f32 %v460_v16, %v234_v22  ;;  %v206_v25 = vpop.f32.mrf.mxu0  ;;  %v216_v26 = vpop.f32.mrf.mxu1 }
  0xac   :  { %v300_v27 = vadd.f32 %v460_v16, %v206_v25  ;;  %v304_v28 = vadd.f32 %v460_v16, %v216_v26 }
  0xad   :  { %323 = vst [vmem:[#allocation6 + $0x40] sm:$0xff] %v307_v23 }
  0xae   :  { %327 = vst [vmem:[#allocation6 + $0x60] sm:$0xff] %v311_v24 }
  0xaf   :  { %316 = vst [vmem:[#allocation6 + $0x8] sm:$0xff] %v300_v27 }
  0xb0   :  { %320 = vst [vmem:[#allocation6 + $0x28] sm:$0xff] %v304_v28 }
  0xb2   :  { %v226_v29 = vpop.f32.mrf.mxu2  ;;  %v236_v30 = vpop.f32.mrf.mxu3 }
  0xb3   :  { %v308_v31 = vadd.f32 %v460_v16, %v226_v29  ;;  %v312_v32 = vadd.f32 %v460_v16, %v236_v30  ;;  %v209_v33 = vpop.f32.mrf.mxu0  ;;  %v219_v34 = vpop.f32.mrf.mxu1 }
  0xb4   :  { %v301_v35 = vadd.f32 %v460_v16, %v209_v33  ;;  %v305_v36 = vadd.f32 %v460_v16, %v219_v34 }
  0xb5   :  { %324 = vst [vmem:[#allocation6 + $0x48] sm:$0xff] %v308_v31 }
  0xb6   :  { %328 = vst [vmem:[#allocation6 + $0x68] sm:$0xff] %v312_v32 }
  0xb7   :  { %317 = vst [vmem:[#allocation6 + $0x10] sm:$0xff] %v301_v35 }
  0xb8   :  { %321 = vst [vmem:[#allocation6 + $0x30] sm:$0xff] %v305_v36 }
  0xba   :  { %v229_v37 = vpop.f32.mrf.mxu2  ;;  %v239_v38 = vpop.f32.mrf.mxu3 }
  0xbb   :  { %v309_v39 = vadd.f32 %v460_v16, %v229_v37  ;;  %v313_v40 = vadd.f32 %v460_v16, %v239_v38  ;;  %v211_v41 = vpop.f32.mrf.mxu0  ;;  %v221_v42 = vpop.f32.mrf.mxu1 }
  0xbc   :  { %v302_v43 = vadd.f32 %v460_v16, %v211_v41  ;;  %v306_v44 = vadd.f32 %v460_v16, %v221_v42 }
  0xbd   :  { %325 = vst [vmem:[#allocation6 + $0x50] sm:$0xff] %v309_v39 }
  0xbe   :  { %329 = vst [vmem:[#allocation6 + $0x70] sm:$0xff] %v313_v40 }
  0xbf   :  { %318 = vst [vmem:[#allocation6 + $0x18] sm:$0xff] %v302_v43 }
  0xc0   :  { %322 = vst [vmem:[#allocation6 + $0x38] sm:$0xff] %v306_v44 }
  0xc2   :  { %v231_v45 = vpop.f32.mrf.mxu2  ;;  %v241_v46 = vpop.f32.mrf.mxu3 }
  0xc3   :  { %v310_v47 = vadd.f32 %v460_v16, %v231_v45  ;;  %v314_v48 = vadd.f32 %v460_v16, %v241_v46 }
  0xc5   :  { %326 = vst [vmem:[#allocation6 + $0x58] sm:$0xff] %v310_v47 }
  0xc6   :  { %330 = vst [vmem:[#allocation6 + $0x78] sm:$0xff] %v314_v48 }
  0xc7   :  { %343 = dma.vmem_to_hbm [thread:$0]  %s336_s2, 2048, %s338_s11, [#allocation5], %s517_s12, %s517_s12, %s518_s13  }
  0xc8   :  { %511 = dma.done.wait [#allocation5], 2048  }
  0xc9   :  { %512 = vsyncadd [#allocation5], 4294965248 }
  0xca   :  { %348 = vsyncpa [#allocation4], 1 }
  0xcb   :  { %349 = vsyncpa [#allocation5], 1 }

// kernel: _lambda_.4
= control target key start
LH: loop header
LB: loop body
LE: loop exit
PB: predicated region body
PF: predicated region fallthrough
CT: control target
= control target key end

     0   :  { %s1452_s12 = smov 0   ;;  %s1454_s13 = smov 0   ;;  %s1716_s0 = inlined_call_operand.vmem [shape: bf16[2,64,384], index: 0, kind: input, shape index: {}, may-alias: {0,1,2}]   ;;  %s1717_s1 = inlined_call_operand.vmem [shape: bf16[2,64,384], index: 1, kind: input, shape index: {}, may-alias: {0,1,2}]   ;;  %s1718_s2 = inlined_call_operand.vmem [shape: bf16[2,64,384], index: 2, kind: input, shape index: {}, may-alias: {0,1,2}]   ;;  %s1719_s3 = inlined_call_operand.vmem [shape: bf16[2,64,128], index: 3, kind: output, shape index: {}]  }
   0x1   :  { %s1456_s14 = smov 0   ;;  %s1458_s15 = smov 0  }
   0x2   :  { %s1460_s16 = smov 0  }
   0x3 LB: > { %s25_s17 = sadd.s32 1, %s1425_s15  ;;  %p41_p1 = scmp.ne.s32.totalorder %s1417_s13, %s1413_s12  ;;  %s1429_s16 = sphi %s1460_s16, %s13_s16   ;;  %s1425_s15 = sphi %s1458_s15, %s1724_s15   ;;  %s1421_s14 = sphi %s1456_s14, %s1723_s14   ;;  %s1417_s13 = sphi %s1454_s13, %s1722_s13   ;;  %s1413_s12 = sphi %s1452_s12, %s1721_s12  }
   0x4   : > { %p27_p0 = scmp.ge.s32.totalorder %s25_s17, 2  ;;  %p42_p2 = scmp.eq.s32.totalorder %s1429_s16, 0 }
   0x5   : > { %s34_s20 = sadd.s32 1, %s1417_s13  ;;  %p1154_p5 = scmp.ge.s32.totalorder %s1429_s16, 2 }
   0x6   : > { %s1726_s17 = smov (%p27_p0, %s25_s17), 0  ;;  %p1483_p3 = por %p42_p2, %p41_p1 }
   0x7   : > { %s29_s19 = ssub.s32 %s1425_s15, %s1726_s17  ;;  %147 = sbr.rel (%p1154_p5) target bundleno = 51 (0x33), region = 16 }
   0x8   : > { %p32_p4 = scmp.eq.s32.totalorder %s29_s19, 0 }
   0xa   : > { %s1491_s21 = scalar_select %p32_p4, %s1417_s13, %s34_s20  }
   0xc   : > { %150 = sbr.rel (!%p1483_p3) target bundleno = 25 (0x19), region = 20  ;;  %s152_s22 = sand.u32 (%p1483_p3), 1, %s1417_s13  }
   0xd   : > { %s1285_s23 = smul.u32 (%p1483_p3), 96, %s1425_s15  ;;  %s1155_s24 = sshll.u32 (%p1483_p3), %s152_s22, 5 }
   0xe   : > { %s154_s28 = scalar_lea.vmem (%p1483_p3), [#allocation3], %s1155_s24 }
   0xf   : > { %s160_s27 = scalar_lea.vmem (%p1483_p3), %s1716_s0, %s1285_s23 }
  0x10   : > { %v177_v0 = vld [vmem:[%s160_s27] sm:$0xf] (%p1483_p3)  ;;  %v179_v1 = vld [vmem:[%s160_s27 + $0xc] sm:$0xf] (%p1483_p3)  ;;  %v181_v2 = vld [vmem:[%s160_s27 + $0x18] sm:$0xf] (%p1483_p3) }
  0x11   : > { %178 = vst [vmem:[%s154_s28] sm:$0xf] %v177_v0  ;;  %v183_v3 = vld [vmem:[%s160_s27 + $0x24] sm:$0xf]  ;;  %v185_v4 = vld [vmem:[%s160_s27 + $0x30] sm:$0xf] }
  0x12   : > { %180 = vst [vmem:[%s154_s28 + $0x4] sm:$0xf] %v179_v1  ;;  %v187_v5 = vld [vmem:[%s160_s27 + $0x3c] sm:$0xf]  ;;  %v189_v6 = vld [vmem:[%s160_s27 + $0x48] sm:$0xf] }
  0x13   : > { %182 = vst [vmem:[%s154_s28 + $0x8] sm:$0xf] %v181_v2  ;;  %v191_v7 = vld [vmem:[%s160_s27 + $0x54] sm:$0xf] }
  0x14   : > { %184 = vst [vmem:[%s154_s28 + $0xc] sm:$0xf] %v183_v3 }
  0x15   : > { %186 = vst [vmem:[%s154_s28 + $0x10] sm:$0xf] %v185_v4 }
  0x16   : > { %188 = vst [vmem:[%s154_s28 + $0x14] sm:$0xf] %v187_v5 }
  0x17   : > { %190 = vst [vmem:[%s154_s28 + $0x18] sm:$0xf] %v189_v6 }
  0x18   : > { %192 = vst [vmem:[%s154_s28 + $0x1c] sm:$0xf] %v191_v7 }
  0x19 PF: > { %232 = sbr.rel (!%p1483_p3) target bundleno = 38 (0x26), region = 61  ;;  %s234_s29 = sand.u32 (%p1483_p3), 1, %s1417_s13  }
  0x1a   : > { %s1158_s30 = smul.u32 (%p1483_p3), 96, %s1425_s15  ;;  %s1157_s4 = sshll.u32 (%p1483_p3), %s234_s29, 5 }
  0x1b   : > { %s236_s8 = scalar_lea.vmem (%p1483_p3), [#allocation4], %s1157_s4 }
  0x1c   : > { %s1062_s7 = scalar_lea.vmem (%p1483_p3), %s1717_s1, %s1158_s30 }
  0x1d   : > { %v1159_v8 = vld [vmem:[%s1062_s7 + $0x4] sm:$0xf] (%p1483_p3)  ;;  %v1160_v9 = vld [vmem:[%s1062_s7 + $0x10] sm:$0xf] (%p1483_p3)  ;;  %v1161_v10 = vld [vmem:[%s1062_s7 + $0x1c] sm:$0xf] (%p1483_p3) }
  0x1e   : > { %258 = vst [vmem:[%s236_s8] sm:$0xf] %v1159_v8  ;;  %v1162_v11 = vld [vmem:[%s1062_s7 + $0x28] sm:$0xf]  ;;  %v1163_v12 = vld [vmem:[%s1062_s7 + $0x34] sm:$0xf] }
  0x1f   : > { %260 = vst [vmem:[%s236_s8 + $0x4] sm:$0xf] %v1160_v9  ;;  %v1164_v13 = vld [vmem:[%s1062_s7 + $0x40] sm:$0xf]  ;;  %v1165_v14 = vld [vmem:[%s1062_s7 + $0x4c] sm:$0xf] }
  0x20   : > { %262 = vst [vmem:[%s236_s8 + $0x8] sm:$0xf] %v1161_v10  ;;  %v1166_v15 = vld [vmem:[%s1062_s7 + $0x58] sm:$0xf] }
  0x21   : > { %264 = vst [vmem:[%s236_s8 + $0xc] sm:$0xf] %v1162_v11 }
  0x22   : > { %266 = vst [vmem:[%s236_s8 + $0x10] sm:$0xf] %v1163_v12 }
  0x23   : > { %268 = vst [vmem:[%s236_s8 + $0x14] sm:$0xf] %v1164_v13 }
  0x24   : > { %270 = vst [vmem:[%s236_s8 + $0x18] sm:$0xf] %v1165_v14 }
  0x25   : > { %272 = vst [vmem:[%s236_s8 + $0x1c] sm:$0xf] %v1166_v15 }
  0x26 PF: > { %312 = sbr.rel (!%p1483_p3) target bundleno = 51 (0x33), region = 102  ;;  %s314_s9 = sand.u32 (%p1483_p3), 1, %s1417_s13  }
  0x27   : > { %s1168_s10 = smul.u32 (%p1483_p3), 96, %s1425_s15  ;;  %s1167_s11 = sshll.u32 (%p1483_p3), %s314_s9, 5 }
  0x28   : > { %s316_s23 = scalar_lea.vmem (%p1483_p3), [#allocation5], %s1167_s11 }
  0x29   : > { %s1068_s22 = scalar_lea.vmem (%p1483_p3), %s1718_s2, %s1168_s10 }
  0x2a   : > { %v1169_v16 = vld [vmem:[%s1068_s22 + $0x8] sm:$0xf] (%p1483_p3)  ;;  %v1170_v17 = vld [vmem:[%s1068_s22 + $0x14] sm:$0xf] (%p1483_p3)  ;;  %v1171_v18 = vld [vmem:[%s1068_s22 + $0x20] sm:$0xf] (%p1483_p3) }
  0x2b   : > { %338 = vst [vmem:[%s316_s23] sm:$0xf] %v1169_v16  ;;  %v1172_v19 = vld [vmem:[%s1068_s22 + $0x2c] sm:$0xf]  ;;  %v1173_v20 = vld [vmem:[%s1068_s22 + $0x38] sm:$0xf] }
  0x2c   : > { %340 = vst [vmem:[%s316_s23 + $0x4] sm:$0xf] %v1170_v17  ;;  %v1174_v21 = vld [vmem:[%s1068_s22 + $0x44] sm:$0xf]  ;;  %v1175_v22 = vld [vmem:[%s1068_s22 + $0x50] sm:$0xf] }
  0x2d   : > { %342 = vst [vmem:[%s316_s23 + $0x8] sm:$0xf] %v1171_v18  ;;  %v1176_v23 = vld [vmem:[%s1068_s22 + $0x5c] sm:$0xf] }
  0x2e   : > { %344 = vst [vmem:[%s316_s23 + $0xc] sm:$0xf] %v1172_v19 }
  0x2f   : > { %346 = vst [vmem:[%s316_s23 + $0x10] sm:$0xf] %v1173_v20 }
  0x30   : > { %348 = vst [vmem:[%s316_s23 + $0x14] sm:$0xf] %v1174_v21 }
  0x31   : > { %350 = vst [vmem:[%s316_s23 + $0x18] sm:$0xf] %v1175_v22 }
  0x32   : > { %352 = vst [vmem:[%s316_s23 + $0x1c] sm:$0xf] %v1176_v23 }
  0x33 PF: > { %p1177_p6 = scmp.ge.s32.totalorder %s1429_s16, 1  ;;  %p391_p7 = scmp.lt.s32.totalorder %s1429_s16, 3 }
  0x35   : > { %p392_p8 = pnand %p1177_p6, %p391_p7 }
  0x36   : > { %s398_s18 = sand.u32 (!%p392_p8), 1, %s1413_s12   ;;  %s1431_s27 = smov (!%p392_p8), 64  }
  0x37   : > { %395 = sbr.rel (%p392_p8) target bundleno = 816 (0x330), region = 143  ;;  %s1518_s24 = sshll.u32 (!%p392_p8), %s398_s18, 5 }
  0x38   : > { %s407_s25 = scalar_lea.vmem (!%p392_p8), [#allocation4], %s1518_s24  ;;  %s400_s26 = scalar_lea.vmem (!%p392_p8), [#allocation3], %s1518_s24 }
  0x39   : > { %s414_s12 = scalar_lea.vmem (!%p392_p8), [#allocation5], %s1518_s24  ;;  %p449_p9 = scmp.lt.s32.totalorder (!%p392_p8), %s1421_s14, 1 }
  0x3c   : > { %v1257_v24 = vld [vmem:[%s407_s25 + $0x18] sm:$0xff]  ;;  %v1255_v25 = vld [vmem:[%s407_s25 + $0x8] sm:$0xff]  ;;  %v1250_v26 = vld [vmem:[%s400_s26] sm:$0xff]  ;;  %vm523_vm0 = vcmask 523264   ;;  %vm988_vm1 = vcmask 1048064   ;;  %s1728_s14 = smov (!%p449_p9, %s1421_s14), 1 }
  0x3d   : > { %756 = vrot.lane.b32.xlu0 %v1257_v24, %s1431_s27  ;;  %752 = vrot.lane.b32.xlu1 %v1255_v25, %s1431_s27  ;;  %v1256_v27 = vld [vmem:[%s407_s25 + $0x10] sm:$0xff]  ;;  %v1254_v28 = vld [vmem:[%s407_s25] sm:$0xff]  ;;  %v546_v32 = vsel %vm523_vm0, %v1257_v24, 0  ;;  %v540_v34 = vsel %vm523_vm0, %v1255_v25, 0  ;;  %s1249_s28 = sshll.u32 %s1728_s14, 5 }
  0x3e   : > { %742 = vrot.lane.b32.xlu2 %v1250_v26, %s1431_s27  ;;  %v1251_v29 = vld [vmem:[%s400_s26 + $0x8] sm:$0xff]  ;;  %v1252_v30 = vld [vmem:[%s400_s26 + $0x10] sm:$0xff]  ;;  %v1253_v31 = vld [vmem:[%s400_s26 + $0x18] sm:$0xff]  ;;  %552 = vmatpush.bf16.xpose.msra.mxu0 %v546_v32  ;;  %v543_v33 = vsel %vm523_vm0, %v1256_v27, 0  ;;  %v537_v37 = vsel %vm523_vm0, %v1254_v28, 0  ;;  %s456_s4 = scalar_lea.vmem %s1719_s3, %s1249_s28 }
  0x3f   : > { %v1261_v46 = vld [vmem:[%s414_s12 + $0x18] sm:$0xff]  ;;  %v1260_v47 = vld [vmem:[%s414_s12 + $0x10] sm:$0xff]  ;;  %v1259_v48 = vld [vmem:[%s414_s12 + $0x8] sm:$0xff] }
  0x40   : > { %693 = vmatpush.bf16.msra.mxu1 %v1261_v46  ;;  %v1258_v49 = vld [vmem:[%s414_s12] sm:$0xff] }
  0x44   : > { %694 = vmatpush.bf16.msra.mxu1 %v1260_v47 }
  0x45   : > { %754 = vrot.lane.b32.xlu0 %v1256_v27, %s1431_s27  ;;  %750 = vrot.lane.b32.xlu1 %v1254_v28, %s1431_s27 }
  0x46   : > { %744 = vrot.lane.b32.xlu2 %v1251_v29, %s1431_s27  ;;  %553 = vmatpush.bf16.xpose.msra.mxu0 %v543_v33 }
  0x48   : > { %695 = vmatpush.bf16.msra.mxu1 %v1259_v48 }
  0x4c   : > { %696 = vmatpush.bf16.msra.mxu1 %v1258_v49 }
  0x4d   : > { %746 = vrot.lane.b32.xlu0 %v1252_v30, %s1431_s27  ;;  %748 = vrot.lane.b32.xlu1 %v1253_v31, %s1431_s27 }
  0x4e   : > { %554 = vmatpush.bf16.xpose.msra.mxu0 %v540_v34  ;;  %893 = vrot.lane.b32.xlu2 %v1261_v46, %s1431_s27 }
  0x56   : > { %555 = vmatpush.bf16.xpose.msra.mxu0 %v537_v37  ;;  %891 = vrot.lane.b32.xlu2 %v1260_v47, %s1431_s27 }
  0x5d   : > { %1215 = vmatmul.msk.bf16.vlgmr.msra.gmra.mxu0 %vm523_vm0, %v1250_v26 }
  0x5e   : > { %889 = vrot.lane.b32.xlu2 %v1259_v48, %s1431_s27 }
  0x66   : > { %887 = vrot.lane.b32.xlu2 %v1258_v49, %s1431_s27 }
  0x6d   : > { %1216 = vmatmul.msk.bf16.gmra.mxu0 %vm523_vm0, %v1251_v29 }
  0x7d   : > { %1217 = vmatmul.msk.bf16.gmra.mxu0 %vm523_vm0, %v1252_v30 }
  0x8d   : > { %1218 = vmatmul.msk.bf16.gmra.mxu0 %vm523_vm0, %v1253_v31 }
  0x98   : > { %v743_v44 = vpop.permute.xlu2 %742 }
  0xa0   : > { %v745_v45 = vpop.permute.xlu2 %744 }
  0xa8   : > { %v894_v2 = vpop.permute.xlu2 %893 }
  0xa9   : > { %915 = vmatpush.bf16.msra.mxu3 %v894_v2 }
  0xaf   : > { %v757_v35 = vpop.permute.xlu0 %756  ;;  %v753_v40 = vpop.permute.xlu1 %752 }
  0xb0   : > { %v780_v36 = vsel %vm523_vm0, %v757_v35, 0  ;;  %v774_v41 = vsel %vm523_vm0, %v753_v40, 0  ;;  %v892_v7 = vpop.permute.xlu2 %891 }
  0xb1   : > { %786 = vmatpush.bf16.xpose.msra.mxu2 %v780_v36  ;;  %916 = vmatpush.bf16.msra.mxu3 %v892_v7 }
  0xb7   : > { %v755_v38 = vpop.permute.xlu0 %754  ;;  %v751_v42 = vpop.permute.xlu1 %750 }
  0xb8   : > { %v777_v39 = vsel %vm523_vm0, %v755_v38, 0  ;;  %v771_v43 = vsel %vm523_vm0, %v751_v42, 0  ;;  %v890_v12 = vpop.permute.xlu2 %889 }
  0xb9   : > { %787 = vmatpush.bf16.xpose.msra.mxu2 %v777_v39  ;;  %917 = vmatpush.bf16.msra.mxu3 %v890_v12 }
  0xbf   : > { %v747_v50 = vpop.permute.xlu0 %746  ;;  %v749_v51 = vpop.permute.xlu1 %748 }
  0xc0   : > { %v888_v17 = vpop.permute.xlu2 %887 }
  0xc1   : > { %788 = vmatpush.bf16.xpose.msra.mxu2 %v774_v41  ;;  %918 = vmatpush.bf16.msra.mxu3 %v888_v17 }
  0xc9   : > { %789 = vmatpush.bf16.xpose.msra.mxu2 %v771_v43 }
  0xd0   : > { %1239 = vmatmul.msk.bf16.vlgmr.msra.gmra.mxu2 %vm523_vm0, %v743_v44 }
  0xda   : > { %v1551_v53 = vpop.f32.mrf.mxu0 }
  0xdb   : > { %v577_v6 = vsel %vm523_vm0, %v1551_v53, -inf }
  0xe0   : > { %1240 = vmatmul.msk.bf16.gmra.mxu2 %vm523_vm0, %v745_v45 }
  0xe2   : > { %v1555_v57 = vpop.f32.mrf.mxu0 }
  0xe3   : > { %v580_v10 = vsel %vm523_vm0, %v1555_v57, -inf }
  0xea   : > { %v1558_v60 = vpop.f32.mrf.mxu0 }
  0xeb   : > { %v583_v15 = vsel %vm523_vm0, %v1558_v60, -inf }
  0xf0   : > { %1241 = vmatmul.msk.bf16.gmra.mxu2 %vm523_vm0, %v747_v50 }
  0xf2   : > { %v1561_v63 = vpop.f32.mrf.mxu0 }
  0xf3   : > { %v586_v16 = vsel %vm523_vm0, %v1561_v63, -inf }
  0xfa   : > { %v1567_v3 = vpop.f32.mrf.mxu0 }
  0xfb   : > { %v589_v20 = vsel %vm523_vm0, %v1567_v3, -inf }
 0x100   : > { %1242 = vmatmul.msk.bf16.gmra.mxu2 %vm523_vm0, %v749_v51 }
 0x102   : > { %v1581_v11 = vpop.f32.mrf.mxu0 }
 0x103   : > { %v592_v21 = vsel %vm523_vm0, %v1581_v11, -inf }
 0x10a   : > { %v1591_v18 = vpop.f32.mrf.mxu0 }
 0x10b   : > { %v595_v19 = vsel %vm523_vm0, %v1591_v18, -inf }
 0x112   : > { %v1599_v22 = vpop.f32.mrf.mxu0 }
 0x113   : > { %v598_v23 = vsel %vm523_vm0, %v1599_v22, -inf }
 0x153   : > { %v791_v52 = vpop.f32.mrf.mxu2 }
 0x154   : > { %v811_v54 = vsel %vm523_vm0, %v791_v52, -inf }
 0x155   : > { %812 = vmax.xlane.f32.xlu0 %v811_v54 }
 0x15b   : > { %v793_v55 = vpop.f32.mrf.mxu2 }
 0x15c   : > { %v814_v56 = vsel %vm523_vm0, %v793_v55, -inf }
 0x15d   : > { %815 = vmax.xlane.f32.xlu1 %v814_v56 }
 0x163   : > { %v796_v58 = vpop.f32.mrf.mxu2 }
 0x164   : > { %v817_v59 = vsel %vm523_vm0, %v796_v58, -inf }
 0x165   : > { %818 = vmax.xlane.f32.xlu2 %v817_v59 }
 0x16b   : > { %v798_v61 = vpop.f32.mrf.mxu2 }
 0x16c   : > { %v820_v62 = vsel %vm523_vm0, %v798_v61, -inf }
 0x16d   : > { %821 = vmax.xlane.f32.xlu0 %v820_v62 }
 0x173   : > { %v1563_v0 = vpop.f32.mrf.mxu2 }
 0x174   : > { %v823_v1 = vsel %vm523_vm0, %v1563_v0, -inf }
 0x175   : > { %824 = vmax.xlane.f32.xlu1 %v823_v1 }
 0x17b   : > { %v1569_v4 = vpop.f32.mrf.mxu2 }
 0x17c   : > { %v826_v5 = vsel %vm523_vm0, %v1569_v4, -inf }
 0x17d   : > { %827 = vmax.xlane.f32.xlu0 %v826_v5  ;;  %578 = vmax.xlane.f32.xlu1 %v577_v6 }
 0x183   : > { %v1575_v8 = vpop.f32.mrf.mxu2 }
 0x184   : > { %v829_v9 = vsel %vm523_vm0, %v1575_v8, -inf }
 0x185   : > { %830 = vmax.xlane.f32.xlu1 %v829_v9  ;;  %581 = vmax.xlane.f32.xlu0 %v580_v10 }
 0x18b   : > { %v1583_v13 = vpop.f32.mrf.mxu2 }
 0x18c   : > { %v832_v14 = vsel %vm523_vm0, %v1583_v13, -inf }
 0x18d   : > { %833 = vmax.xlane.f32.xlu2 %v832_v14  ;;  %584 = vmax.xlane.f32.xlu0 %v583_v15 }
 0x18e   : > { %587 = vmax.xlane.f32.xlu1 %v586_v16 }
 0x195   : > { %590 = vmax.xlane.f32.xlu2 %v589_v20  ;;  %593 = vmax.xlane.f32.xlu0 %v592_v21 }
 0x196   : > { %596 = vmax.xlane.f32.xlu1 %v595_v19 }
 0x19d   : > { %599 = vmax.xlane.f32.xlu2 %v598_v23 }
 0x1c8   : > { %v813_v24 = vpop.xlane.xlu0 %812 }
 0x1c9   : > { %v835_v25 = vsub.f32 %v791_v52, %v813_v24 }
 0x1cb   : > { %v843_v26 = vmul.f32 1.442695, %v835_v25 }
 0x1cd   : > { %1327 = vpow2.f32 %v843_v26 }
 0x1d0   : > { %v816_v27 = vpop.xlane.xlu1 %815 }
 0x1d1   : > { %v836_v28 = vsub.f32 %v793_v55, %v816_v27 }
 0x1d3   : > { %v845_v29 = vmul.f32 1.442695, %v836_v28  ;;  %v1603_v31 = vpop.eup %1327 }
 0x1d5   : > { %1329 = vpow2.f32 %v845_v29 }
 0x1d8   : > { %v819_v30 = vpop.xlane.xlu2 %818 }
 0x1d9   : > { %v837_v33 = vsub.f32 %v796_v58, %v819_v30 }
 0x1db   : > { %v1605_v32 = vpop.eup %1329  ;;  %v847_v35 = vmul.f32 1.442695, %v837_v33 }
 0x1dc   : > { %v883_v34 = vpack.c.bf16 %v1605_v32, %v1603_v31 }
 0x1dd   : > { %1331 = vpow2.f32 %v847_v35 }
 0x1de   : > { %1243 = vmatmul.msk.bf16.vlgmr.msra.gmra.mxu3 %vm523_vm0, %v883_v34 }
 0x1e0   : > { %v822_v36 = vpop.xlane.xlu0 %821 }
 0x1e1   : > { %v838_v37 = vsub.f32 %v798_v61, %v822_v36 }
 0x1e3   : > { %v849_v38 = vmul.f32 1.442695, %v838_v37  ;;  %v1610_v40 = vpop.eup %1331 }
 0x1e5   : > { %1333 = vpow2.f32 %v849_v38 }
 0x1e8   : > { %v825_v39 = vpop.xlane.xlu1 %824 }
 0x1e9   : > { %v839_v42 = vsub.f32 %v1563_v0, %v825_v39 }
 0x1eb   : > { %v1612_v41 = vpop.eup %1333  ;;  %v851_v44 = vmul.f32 1.442695, %v839_v42  ;;  %v862_v42 = vsel %vm523_vm0, %v1605_v32, 0.0 }
 0x1ec   : > { %v884_v43 = vpack.c.bf16 %v1612_v41, %v1610_v40  ;;  %v868_v32 = vsel %vm523_vm0, %v1612_v41, 0.0 }
 0x1ed   : > { %1335 = vpow2.f32 %v851_v44  ;;  %v859_v44 = vsel %vm523_vm0, %v1603_v31, 0.0 }
 0x1ee   : > { %1244 = vmatmul.msk.bf16.gmra.mxu3 %vm523_vm0, %v884_v43  ;;  %v865_v43 = vsel %vm523_vm0, %v1610_v40, 0.0 }
 0x1f0   : > { %v828_v45 = vpop.xlane.xlu0 %827  ;;  %v579_v46 = vpop.xlane.xlu1 %578 }
 0x1f1   : > { %v840_v47 = vsub.f32 %v1569_v4, %v828_v45  ;;  %v601_v48 = vsub.f32 %v1551_v53, %v579_v46 }
 0x1f3   : > { %v853_v49 = vmul.f32 1.442695, %v840_v47  ;;  %v609_v50 = vmul.f32 1.442695, %v601_v48  ;;  %v1621_v55 = vpop.eup %1335 }
 0x1f4   : > { %v871_v45 = vsel %vm523_vm0, %v1621_v55, 0.0 }
 0x1f5   : > { %1337 = vpow2.f32 %v853_v49 }
 0x1f6   : > { %1339 = vpow2.f32 %v609_v50 }
 0x1f8   : > { %v831_v51 = vpop.xlane.xlu1 %830  ;;  %v582_v52 = vpop.xlane.xlu0 %581 }
 0x1f9   : > { %v602_v54 = vsub.f32 %v1555_v57, %v582_v52  ;;  %v841_v61 = vsub.f32 %v1575_v8, %v831_v51 }
 0x1fb   : > { %v1623_v56 = vpop.eup %1337  ;;  %v611_v58 = vmul.f32 1.442695, %v602_v54  ;;  %v855_v0 = vmul.f32 1.442695, %v841_v61 }
 0x1fc   : > { %v1340_v59 = vpop.eup %1339  ;;  %v885_v53 = vpack.c.bf16 %v1623_v56, %v1621_v55  ;;  %v874_v47 = vsel %vm523_vm0, %v1623_v56, 0.0 }
 0x1fd   : > { %v625_v62 = vsel %vm523_vm0, %v1340_v59, 0.0  ;;  %1341 = vpow2.f32 %v611_v58 }
 0x1fe   : > { %626 = vadd.xlane.f32.xlu2 %v625_v62  ;;  %1245 = vmatmul.msk.bf16.gmra.mxu3 %vm523_vm0, %v885_v53  ;;  %1343 = vpow2.f32 %v855_v0 }
 0x200   : > { %v834_v1 = vpop.xlane.xlu2 %833  ;;  %v585_v57 = vpop.xlane.xlu0 %584 }
 0x201   : > { %v842_v2 = vsub.f32 %v1583_v13, %v834_v1  ;;  %v603_v4 = vsub.f32 %v1558_v60, %v585_v57  ;;  %v588_v5 = vpop.xlane.xlu1 %587 }
 0x202   : > { %v604_v6 = vsub.f32 %v1561_v63, %v588_v5 }
 0x203   : > { %v857_v7 = vmul.f32 1.442695, %v842_v2  ;;  %v613_v8 = vmul.f32 1.442695, %v603_v4  ;;  %v1342_v9 = vpop.eup %1341 }
 0x204   : > { %v615_v10 = vmul.f32 1.442695, %v604_v6  ;;  %v628_v12 = vsel %vm523_vm0, %v1342_v9, 0.0  ;;  %v649_v14 = vpack.c.bf16 %v1342_v9, %v1340_v59  ;;  %v1344_v17 = vpop.eup %1343 }
 0x205   : > { %1345 = vpow2.f32 %v857_v7  ;;  %629 = vadd.xlane.f32.xlu0 %v628_v12  ;;  %v877_v31 = vsel %vm523_vm0, %v1344_v17, 0.0 }
 0x206   : > { %1347 = vpow2.f32 %v613_v8  ;;  %1235 = vmatmul.msk.bf16.vlgmr.msra.gmra.mxu1 %vm523_vm0, %v649_v14 }
 0x207   : > { %1349 = vpow2.f32 %v615_v10 }
 0x208   : > { %v591_v13 = vpop.xlane.xlu2 %590  ;;  %v594_v15 = vpop.xlane.xlu0 %593 }
 0x209   : > { %v605_v60 = vsub.f32 %v1567_v3, %v591_v13  ;;  %v606_v63 = vsub.f32 %v1581_v11, %v594_v15  ;;  %v597_v16 = vpop.xlane.xlu1 %596 }
 0x20a   : > { %v607_v19 = vsub.f32 %v1591_v18, %v597_v16 }
 0x20b   : > { %v1346_v20 = vpop.eup %1345  ;;  %v617_v21 = vmul.f32 1.442695, %v605_v60  ;;  %v619_v23 = vmul.f32 1.442695, %v606_v63 }
 0x20c   : > { %v1348_v24 = vpop.eup %1347  ;;  %v621_v25 = vmul.f32 1.442695, %v607_v19  ;;  %v886_v26 = vpack.c.bf16 %v1346_v20, %v1344_v17  ;;  %v880_v40 = vsel %vm523_vm0, %v1346_v20, 0.0 }
 0x20d   : > { %v1350_v27 = vpop.eup %1349  ;;  %1351 = vpow2.f32 %v617_v21  ;;  %v631_v28 = vsel %vm523_vm0, %v1348_v24, 0.0 }
 0x20e   : > { %1353 = vpow2.f32 %v619_v23  ;;  %632 = vadd.xlane.f32.xlu1 %v631_v28  ;;  %v634_v3 = vsel %vm523_vm0, %v1350_v27, 0.0  ;;  %1246 = vmatmul.msk.bf16.gmra.mxu3 %vm523_vm0, %v886_v26  ;;  %v650_v37 = vpack.c.bf16 %v1350_v27, %v1348_v24 }
 0x20f   : > { %1355 = vpow2.f32 %v621_v25  ;;  %635 = vadd.xlane.f32.xlu2 %v634_v3 }
 0x210   : > { %v600_v11 = vpop.xlane.xlu2 %599 }
 0x211   : > { %v608_v18 = vsub.f32 %v1599_v22, %v600_v11 }
 0x213   : > { %v1352_v29 = vpop.eup %1351  ;;  %v623_v30 = vmul.f32 1.442695, %v608_v18 }
 0x214   : > { %v1354_v33 = vpop.eup %1353  ;;  %v637_v34 = vsel %vm523_vm0, %v1352_v29, 0.0 }
 0x215   : > { %v1356_v35 = vpop.eup %1355  ;;  %1357 = vpow2.f32 %v623_v30  ;;  %638 = vadd.xlane.f32.xlu0 %v637_v34  ;;  %v640_v36 = vsel %vm523_vm0, %v1354_v33, 0.0  ;;  %v651_v46 = vpack.c.bf16 %v1354_v33, %v1352_v29 }
 0x216   : > { %641 = vadd.xlane.f32.xlu1 %v640_v36  ;;  %v643_v38 = vsel %vm523_vm0, %v1356_v35, 0.0  ;;  %1236 = vmatmul.msk.bf16.gmra.mxu1 %vm523_vm0, %v650_v37 }
 0x217   : > { %644 = vadd.xlane.f32.xlu2 %v643_v38 }
 0x21b   : > { %v1358_v39 = vpop.eup %1357 }
 0x21c   : > { %v646_v22 = vsel %vm523_vm0, %v1358_v39, 0.0  ;;  %v652_v48 = vpack.c.bf16 %v1358_v39, %v1356_v35 }
 0x21d   : > { %647 = vadd.xlane.f32.xlu0 %v646_v22 }
 0x21e   : > { %863 = vadd.xlane.f32.xlu1 %v862_v42 }
 0x21f   : > { %866 = vadd.xlane.f32.xlu2 %v865_v43 }
 0x225   : > { %860 = vadd.xlane.f32.xlu0 %v859_v44 }
 0x226   : > { %872 = vadd.xlane.f32.xlu1 %v871_v45  ;;  %1237 = vmatmul.msk.bf16.gmra.mxu1 %vm523_vm0, %v651_v46 }
 0x227   : > { %875 = vadd.xlane.f32.xlu2 %v874_v47 }
 0x22d   : > { %869 = vadd.xlane.f32.xlu0 %v868_v32 }
 0x22e   : > { %881 = vadd.xlane.f32.xlu1 %v880_v40 }
 0x235   : > { %878 = vadd.xlane.f32.xlu0 %v877_v31 }
 0x236   : > { %1238 = vmatmul.msk.bf16.gmra.mxu1 %vm523_vm0, %v652_v48 }
 0x261   : > { %v920_v49 = vpop.f32.mrf.mxu3 }
 0x269   : > { %v922_v50 = vpop.f32.mrf.mxu3 }
 0x271   : > { %v925_v51 = vpop.f32.mrf.mxu3  ;;  %v627_v52 = vpop.xlane.xlu2 %626 }
 0x272   : > { %1359 = vrcp.f32 %v627_v52 }
 0x278   : > { %v630_v54 = vpop.xlane.xlu0 %629  ;;  %v1360_v58 = vpop.eup %1359 }
 0x279   : > { %v1663_v55 = vpop.f32.mrf.mxu3  ;;  %1361 = vrcp.f32 %v630_v54 }
 0x27f   : > { %v1362_v57 = vpop.eup %1361 }
 0x281   : > { %v633_v56 = vpop.xlane.xlu1 %632  ;;  %v930_v0 = vpop.f32.mrf.mxu3 }
 0x282   : > { %v636_v41 = vpop.xlane.xlu2 %635  ;;  %1363 = vrcp.f32 %v633_v56 }
 0x283   : > { %v698_v59 = vpop.f32.mrf.mxu1 }
 0x284   : > { %v726_v61 = vmul.f32 %v1360_v58, %v698_v59 }
 0x286   : > { %734 = vst.msk [vmem:[#allocation2] sm:$0xff] %vm523_vm0, %v726_v61 }
 0x288   : > { %v639_v53 = vpop.xlane.xlu0 %638  ;;  %v1364_v8 = vpop.eup %1363 }
 0x289   : > { %v642_v62 = vpop.xlane.xlu1 %641  ;;  %v932_v9 = vpop.f32.mrf.mxu3 }
 0x28a   : > { %v1666_v1 = vpop.xlane.xlu2 %644 }
 0x28b   : > { %v700_v2 = vpop.f32.mrf.mxu1 }
 0x28c   : > { %v727_v4 = vmul.f32 %v1362_v57, %v700_v2 }
 0x28e   : > { %735 = vst.msk [vmem:[#allocation2 + $0x8] sm:$0xff] %vm523_vm0, %v727_v4 }
 0x290   : > { %v1669_v5 = vpop.xlane.xlu0 %647 }
 0x291   : > { %v864_v6 = vpop.xlane.xlu1 %863  ;;  %v935_v23 = vpop.f32.mrf.mxu3 }
 0x292   : > { %1365 = vrcp.f32 %v864_v6  ;;  %v867_v7 = vpop.xlane.xlu2 %866 }
 0x293   : > { %1367 = vrcp.f32 %v867_v7  ;;  %v703_v10 = vpop.f32.mrf.mxu1 }
 0x294   : > { %v728_v12 = vmul.f32 %v1364_v8, %v703_v10  ;;  %1369 = vrcp.f32 %v636_v41 }
 0x296   : > { %736 = vst.msk [vmem:[#allocation2 + $0x10] sm:$0xff] %vm523_vm0, %v728_v12 }
 0x298   : > { %v1366_v14 = vpop.eup %1365  ;;  %v861_v13 = vpop.xlane.xlu0 %860 }
 0x299   : > { %v1368_v15 = vpop.eup %1367  ;;  %v873_v60 = vpop.xlane.xlu1 %872  ;;  %1371 = vrcp.f32 %v861_v13  ;;  %v949_v63 = vmul.f32 %v1366_v14, %v922_v50 }
 0x29a   : > { %1373 = vrcp.f32 %v873_v60  ;;  %v876_v16 = vpop.xlane.xlu2 %875  ;;  %v950_v17 = vmul.f32 %v1368_v15, %v925_v51  ;;  %v1370_v19 = vpop.eup %1369 }
 0x29b   : > { %1375 = vrcp.f32 %v876_v16  ;;  %966 = vrot.lane.b32.xlu2 %v949_v63, %s1431_s27  ;;  %v705_v20 = vpop.f32.mrf.mxu1  ;;  %v937_v36 = vpop.f32.mrf.mxu3 }
 0x29c   : > { %968 = vrot.lane.b32.xlu0 %v950_v17, %s1431_s27  ;;  %v729_v21 = vmul.f32 %v1370_v19, %v705_v20  ;;  %1377 = vrcp.f32 %v639_v53 }
 0x29e   : > { %737 = vst.msk [vmem:[#allocation2 + $0x18] sm:$0xff] %vm523_vm0, %v729_v21 }
 0x29f   : > { %v1372_v24 = vpop.eup %1371 }
 0x2a0   : > { %v1374_v25 = vpop.eup %1373  ;;  %v870_v26 = vpop.xlane.xlu0 %869  ;;  %v948_v27 = vmul.f32 %v1372_v24, %v920_v49 }
 0x2a1   : > { %v1376_v28 = vpop.eup %1375  ;;  %v882_v3 = vpop.xlane.xlu1 %881  ;;  %1379 = vrcp.f32 %v870_v26  ;;  %v952_v11 = vmul.f32 %v1374_v25, %v930_v0 }
 0x2a2   : > { %1381 = vrcp.f32 %v882_v3  ;;  %964 = vrot.lane.b32.xlu1 %v948_v27, %s1431_s27  ;;  %v953_v18 = vmul.f32 %v1376_v28, %v932_v9  ;;  %v1378_v29 = vpop.eup %1377 }
 0x2a3   : > { %v708_v30 = vpop.f32.mrf.mxu1  ;;  %1383 = vrcp.f32 %v642_v62 }
 0x2a4   : > { %972 = vrot.lane.b32.xlu0 %v952_v11, %s1431_s27  ;;  %974 = vrot.lane.b32.xlu2 %v953_v18, %s1431_s27  ;;  %v730_v33 = vmul.f32 %v1378_v29, %v708_v30 }
 0x2a6   : > { %738 = vst.msk [vmem:[#allocation2 + $0x20] sm:$0xff] %vm523_vm0, %v730_v33 }
 0x2a7   : > { %v1380_v34 = vpop.eup %1379 }
 0x2a8   : > { %v1382_v35 = vpop.eup %1381  ;;  %v879_v37 = vpop.xlane.xlu0 %878  ;;  %v951_v38 = vmul.f32 %v1380_v34, %v1663_v55 }
 0x2a9   : > { %1385 = vrcp.f32 %v879_v37  ;;  %v955_v39 = vmul.f32 %v1382_v35, %v937_v36  ;;  %v1384_v22 = vpop.eup %1383 }
 0x2aa   : > { %970 = vrot.lane.b32.xlu1 %v951_v38, %s1431_s27  ;;  %1387 = vrcp.f32 %v1666_v1 }
 0x2ab   : > { %v710_v42 = vpop.f32.mrf.mxu1  ;;  %1389 = vrcp.f32 %v1669_v5 }
 0x2ac   : > { %978 = vrot.lane.b32.xlu0 %v955_v39, %s1431_s27  ;;  %v731_v43 = vmul.f32 %v1384_v22, %v710_v42 }
 0x2ae   : > { %739 = vst.msk [vmem:[#allocation2 + $0x28] sm:$0xff] %vm523_vm0, %v731_v43 }
 0x2af   : > { %v1386_v44 = vpop.eup %1385 }
 0x2b0   : > { %v954_v45 = vmul.f32 %v1386_v44, %v935_v23  ;;  %v1388_v46 = vpop.eup %1387 }
 0x2b1   : > { %v1390_v40 = vpop.eup %1389 }
 0x2b2   : > { %976 = vrot.lane.b32.xlu1 %v954_v45, %s1431_s27 }
 0x2b3   : > { %v713_v47 = vpop.f32.mrf.mxu1 }
 0x2b4   : > { %v732_v32 = vmul.f32 %v1388_v46, %v713_v47 }
 0x2b6   : > { %740 = vst.msk [vmem:[#allocation2 + $0x30] sm:$0xff] %vm523_vm0, %v732_v32 }
 0x2bb   : > { %v715_v31 = vpop.f32.mrf.mxu1 }
 0x2bc   : > { %v733_v48 = vmul.f32 %v1390_v40, %v715_v31 }
 0x2be   : > { %741 = vst.msk [vmem:[#allocation2 + $0x38] sm:$0xff] %vm523_vm0, %v733_v48 }
 0x2f5   : > { %v967_v49 = vpop.permute.xlu2 %966 }
 0x2f6   : > { %990 = vst.msk [vmem:[#allocation2 + $0x8] sm:$0xff] %vm988_vm1, %v967_v49 }
 0x2fd   : > { %v998_v55 = vld [vmem:[#allocation2 + $0x8] sm:$0xff] }
 0x2fe   : > { %v975_v50 = vpop.permute.xlu2 %974 }
 0x2ff   : > { %994 = vst.msk [vmem:[#allocation2 + $0x28] sm:$0xff] %vm988_vm1, %v975_v50 }
 0x306   : > { %v1002_v59 = vld [vmem:[#allocation2 + $0x28] sm:$0xff] }
 0x30e   : > { %v969_v51 = vpop.permute.xlu0 %968 }
 0x30f   : > { %991 = vst.msk [vmem:[#allocation2 + $0x10] sm:$0xff] %vm988_vm1, %v969_v51 }
 0x314   : > { %v965_v52 = vpop.permute.xlu1 %964 }
 0x315   : > { %989 = vst.msk [vmem:[#allocation2] sm:$0xff] %vm988_vm1, %v965_v52 }
 0x316   : > { %v973_v54 = vpop.permute.xlu0 %972  ;;  %v999_v0 = vld [vmem:[#allocation2 + $0x10] sm:$0xff] }
 0x317   : > { %993 = vst.msk [vmem:[#allocation2 + $0x20] sm:$0xff] %vm988_vm1, %v973_v54 }
 0x31c   : > { %v997_v56 = vld [vmem:[#allocation2] sm:$0xff]  ;;  %v971_v41 = vpop.permute.xlu1 %970 }
 0x31d   : > { %v1265_v58 = vpack.c.bf16 %v998_v55, %v997_v56  ;;  %992 = vst.msk [vmem:[#allocation2 + $0x18] sm:$0xff] %vm988_vm1, %v971_v41 }
 0x31e   : > { %v1001_v61 = vld [vmem:[#allocation2 + $0x20] sm:$0xff]  ;;  %v979_v53 = vpop.permute.xlu0 %978 }
 0x31f   : > { %1266 = vst [vmem:[%s456_s4] sm:$0xff] %v1265_v58   ;;  %v1275_v62 = vpack.c.bf16 %v1002_v59, %v1001_v61 }
 0x320   : > { %996 = vst.msk [vmem:[#allocation2 + $0x38] sm:$0xff] %vm988_vm1, %v979_v53 }
 0x321   : > { %1283 = vst [vmem:[%s456_s4 + $0x10] sm:$0xff] %v1275_v62  }
 0x324   : > { %v1000_v1 = vld [vmem:[#allocation2 + $0x18] sm:$0xff]  ;;  %v977_v57 = vpop.permute.xlu1 %976 }
 0x325   : > { %v1270_v2 = vpack.c.bf16 %v1000_v1, %v999_v0  ;;  %995 = vst.msk [vmem:[#allocation2 + $0x30] sm:$0xff] %vm988_vm1, %v977_v57 }
 0x327   : > { %1282 = vst [vmem:[%s456_s4 + $0x8] sm:$0xff] %v1270_v2   ;;  %v1004_v4 = vld [vmem:[#allocation2 + $0x38] sm:$0xff] }
 0x32c   : > { %v1003_v5 = vld [vmem:[#allocation2 + $0x30] sm:$0xff] }
 0x32d   : > { %v1280_v6 = vpack.c.bf16 %v1004_v4, %v1003_v5 }
 0x32f   : > { %1284 = vst [vmem:[%s456_s4 + $0x18] sm:$0xff] %v1280_v6  }
 0x330 PF: > { %s13_s16 = sadd.s32 1, %s1429_s16   ;;  %s1721_s12 = smov %s1417_s13 }
 0x331   : > { %p10_p10 = scmp.ge.s32.totalorder %s13_s16, 4   ;;  %s1722_s13 = smov %s1491_s21 }
 0x332   : > { %s1723_s14 = smov %s1425_s15  ;;  %s1724_s15 = smov %s1726_s17 }
 0x333   :  { %12 = sbr.rel (!%p10_p10) target bundleno = 3 (0x3), region = 206 }

// kernel: _lambda_.3
= control target key start
LH: loop header
LB: loop body
LE: loop exit
PB: predicated region body
PF: predicated region fallthrough
CT: control target
= control target key end

     0   :  { %8 = vsyncpa [#allocation4], 0  ;;  %s1185_s0 = inlined_call_operand.hbm [shape: f32[128,128], index: 0, kind: input, shape index: {}]   ;;  %s1186_s1 = inlined_call_operand.hbm [shape: bf16[128,384], index: 1, kind: input, shape index: {}]   ;;  %s1187_s2 = inlined_call_operand.vmem [shape: f32[1,384], index: 2, kind: input, shape index: {}]   ;;  %s1188_s3 = inlined_call_operand.vmem [shape: bf16[128,384], index: 3, kind: output, shape index: {}]  }
   0x1   :  { %s14_s14 = sshll.u32 %s1185_s0, 4  ;;  %s15_s14 = int_to_ptr.hbm [resolvable:$true] %s14_s14 }
   0x2   :  { %9 = vsyncpa [#allocation6], 0  ;;  %s952_s15 = smov [#allocation3]   ;;  %s27_s19 = sshll.u32 %s1186_s1, 4  ;;  %s28_s19 = int_to_ptr.hbm [resolvable:$true] %s27_s19 }
   0x3   :  { %s16_s16 = sshll.u32 %s952_s15, 4  ;;  %s953_s20 = smov 128   ;;  %s17_s16 = int_to_ptr.vmem [resolvable:$true] %s16_s16 }
   0x4   :  { %s954_s21 = smov 8   ;;  %s955_s22 = smov [#allocation5]  }
   0x5   :  { %22 = dma.hbm_to_vmem [thread:$0]  %s15_s14, 2048, %s17_s16, [#allocation4], %s953_s20, %s953_s20, %s954_s21  }
   0x6   :  { %s29_s23 = sshll.u32 %s955_s22, 4  ;;  %s956_s24 = smov 192   ;;  %s30_s23 = int_to_ptr.vmem [resolvable:$true] %s29_s23 }
   0x7   :  { %s957_s25 = smov 12  }
   0x8   :  { %35 = dma.hbm_to_vmem [thread:$0]  %s28_s19, 3072, %s30_s23, [#allocation6], %s956_s24, %s956_s24, %s957_s25  }
   0x9   :  { %948 = dma.done.wait [#allocation4], 2048  }
   0xa   :  { %949 = vsyncadd [#allocation4], 4294965248 }
   0xb   :  { %950 = dma.done.wait [#allocation6], 3072  }
   0xc   :  { %951 = vsyncadd [#allocation6], 4294964224  ;;  %v836_v0 = vld [vmem:[#allocation5 + $0xa8] sm:$0xf]  ;;  %v868_v1 = vld [vmem:[#allocation5 + $0xb0] sm:$0xf0] }
   0xd   :  { %v867_v2 = vld [vmem:[#allocation5 + $0xac] sm:$0xf]  ;;  %v837_v3 = vor.u32 %v868_v1, %v836_v0  ;;  %v838_v4 = vld [vmem:[#allocation5 + $0xb4] sm:$0xf0]  ;;  %v844_v5 = vld [vmem:[#allocation5 + $0xb0] sm:$0xf] }
   0xe   :  { %v869_v6 = vld [vmem:[#allocation5 + $0xb8] sm:$0xf0]  ;;  %v984_v7 = vor.u32 %v867_v2, %v838_v4  ;;  %v824_v9 = vld [vmem:[#allocation5 + $0x90] sm:$0xf]  ;;  %v864_v11 = vld [vmem:[#allocation5 + $0x94] sm:$0xf] }
   0xf   :  { %v986_v8 = vor.u32 %v869_v6, %v844_v5  ;;  %v865_v10 = vld [vmem:[#allocation5 + $0x98] sm:$0xf0]  ;;  %330 = vmatpush.bf16.msra.mxu0 %v837_v3  ;;  %870 = vmatpush.bf16.msra.mxu3 %v837_v3  ;;  %v826_v13 = vld [vmem:[#allocation5 + $0x9c] sm:$0xf0]  ;;  %v832_v14 = vld [vmem:[#allocation5 + $0x98] sm:$0xf] }
  0x10   :  { %v825_v12 = vor.u32 %v865_v10, %v824_v9  ;;  %v866_v15 = vld [vmem:[#allocation5 + $0xa0] sm:$0xf0]  ;;  %379 = vmatpush.bf16.msra.mxu1 %v984_v7  ;;  %v990_v16 = vor.u32 %v864_v11, %v826_v13  ;;  %v812_v18 = vld [vmem:[#allocation5 + $0x78] sm:$0xf]  ;;  %v861_v20 = vld [vmem:[#allocation5 + $0x7c] sm:$0xf] }
  0x11   :  { %428 = vmatpush.bf16.msra.mxu2 %v986_v8  ;;  %v992_v17 = vor.u32 %v866_v15, %v832_v14  ;;  %v862_v19 = vld [vmem:[#allocation5 + $0x80] sm:$0xf0]  ;;  %v814_v21 = vld [vmem:[#allocation5 + $0x84] sm:$0xf0]  ;;  %v820_v22 = vld [vmem:[#allocation5 + $0x80] sm:$0xf] }
  0x12   :  { %v863_v23 = vld [vmem:[#allocation5 + $0x88] sm:$0xf0]  ;;  %v813_v24 = vor.u32 %v862_v19, %v812_v18  ;;  %v996_v25 = vor.u32 %v861_v20, %v814_v21  ;;  %v800_v27 = vld [vmem:[#allocation5 + $0x60] sm:$0xf]  ;;  %v858_v29 = vld [vmem:[#allocation5 + $0x64] sm:$0xf] }
  0x13   :  { %331 = vmatpush.bf16.msra.mxu0 %v825_v12  ;;  %871 = vmatpush.bf16.msra.mxu3 %v825_v12  ;;  %v998_v26 = vor.u32 %v863_v23, %v820_v22  ;;  %v859_v28 = vld [vmem:[#allocation5 + $0x68] sm:$0xf0]  ;;  %v802_v30 = vld [vmem:[#allocation5 + $0x6c] sm:$0xf0]  ;;  %v808_v31 = vld [vmem:[#allocation5 + $0x68] sm:$0xf] }
  0x14   :  { %380 = vmatpush.bf16.msra.mxu1 %v990_v16  ;;  %v860_v32 = vld [vmem:[#allocation5 + $0x70] sm:$0xf0]  ;;  %v801_v33 = vor.u32 %v859_v28, %v800_v27  ;;  %v1002_v34 = vor.u32 %v858_v29, %v802_v30  ;;  %v788_v36 = vld [vmem:[#allocation5 + $0x48] sm:$0xf]  ;;  %v855_v38 = vld [vmem:[#allocation5 + $0x4c] sm:$0xf] }
  0x15   :  { %429 = vmatpush.bf16.msra.mxu2 %v992_v17  ;;  %v1004_v35 = vor.u32 %v860_v32, %v808_v31  ;;  %v856_v37 = vld [vmem:[#allocation5 + $0x50] sm:$0xf0]  ;;  %v790_v39 = vld [vmem:[#allocation5 + $0x54] sm:$0xf0]  ;;  %v796_v40 = vld [vmem:[#allocation5 + $0x50] sm:$0xf] }
  0x16   :  { %v857_v41 = vld [vmem:[#allocation5 + $0x58] sm:$0xf0]  ;;  %v789_v42 = vor.u32 %v856_v37, %v788_v36  ;;  %v1008_v43 = vor.u32 %v855_v38, %v790_v39  ;;  %v776_v45 = vld [vmem:[#allocation5 + $0x30] sm:$0xf]  ;;  %v852_v47 = vld [vmem:[#allocation5 + $0x34] sm:$0xf] }
  0x17   :  { %332 = vmatpush.bf16.msra.mxu0 %v813_v24  ;;  %872 = vmatpush.bf16.msra.mxu3 %v813_v24  ;;  %v1010_v44 = vor.u32 %v857_v41, %v796_v40  ;;  %v853_v46 = vld [vmem:[#allocation5 + $0x38] sm:$0xf0]  ;;  %v778_v48 = vld [vmem:[#allocation5 + $0x3c] sm:$0xf0]  ;;  %v784_v49 = vld [vmem:[#allocation5 + $0x38] sm:$0xf] }
  0x18   :  { %381 = vmatpush.bf16.msra.mxu1 %v996_v25  ;;  %v854_v50 = vld [vmem:[#allocation5 + $0x40] sm:$0xf0]  ;;  %v777_v51 = vor.u32 %v853_v46, %v776_v45  ;;  %v781_v52 = vor.u32 %v852_v47, %v778_v48  ;;  %v764_v54 = vld [vmem:[#allocation5 + $0x18] sm:$0xf]  ;;  %v849_v56 = vld [vmem:[#allocation5 + $0x1c] sm:$0xf] }
  0x19   :  { %430 = vmatpush.bf16.msra.mxu2 %v998_v26  ;;  %v1014_v53 = vor.u32 %v854_v50, %v784_v49  ;;  %v850_v55 = vld [vmem:[#allocation5 + $0x20] sm:$0xf0]  ;;  %v766_v57 = vld [vmem:[#allocation5 + $0x24] sm:$0xf0]  ;;  %v772_v58 = vld [vmem:[#allocation5 + $0x20] sm:$0xf] }
  0x1a   :  { %v851_v59 = vld [vmem:[#allocation5 + $0x28] sm:$0xf0]  ;;  %v765_v60 = vor.u32 %v850_v55, %v764_v54  ;;  %v769_v61 = vor.u32 %v849_v56, %v766_v57  ;;  %v752_v63 = vld [vmem:[#allocation5] sm:$0xf]  ;;  %v846_v1 = vld [vmem:[#allocation5 + $0x4] sm:$0xf] }
  0x1b   :  { %333 = vmatpush.bf16.msra.mxu0 %v801_v33  ;;  %873 = vmatpush.bf16.msra.mxu3 %v801_v33  ;;  %v1017_v62 = vor.u32 %v851_v59, %v772_v58  ;;  %v847_v0 = vld [vmem:[#allocation5 + $0x8] sm:$0xf0]  ;;  %v754_v2 = vld [vmem:[#allocation5 + $0xc] sm:$0xf0]  ;;  %v760_v3 = vld [vmem:[#allocation5 + $0x8] sm:$0xf] }
  0x1c   :  { %382 = vmatpush.bf16.msra.mxu1 %v1002_v34  ;;  %v848_v4 = vld [vmem:[#allocation5 + $0x10] sm:$0xf0]  ;;  %v146_v5 = vld [vmem:[#allocation3] sm:$0xff]  ;;  %v753_v6 = vor.u32 %v847_v0, %v752_v63  ;;  %v147_v9 = vld [vmem:[#allocation3 + $0x8] sm:$0xff]  ;;  %v757_v12 = vor.u32 %v846_v1, %v754_v2 }
  0x1d   :  { %431 = vmatpush.bf16.msra.mxu2 %v1004_v35  ;;  %v158_v10 = vld [vmem:[#allocation3 + $0x60] sm:$0xff]  ;;  %v159_v11 = vld [vmem:[#allocation3 + $0x68] sm:$0xff]  ;;  %v761_v13 = vor.u32 %v848_v4, %v760_v3  ;;  %v162_v14 = vpack.c.bf16 %v147_v9, %v146_v5  ;;  %v148_v18 = vld [vmem:[#allocation3 + $0x10] sm:$0xff] }
  0x1e   :  { %v168_v15 = vpack.c.bf16 %v159_v11, %v158_v10  ;;  %v149_v19 = vld [vmem:[#allocation3 + $0x18] sm:$0xff]  ;;  %v160_v20 = vld [vmem:[#allocation3 + $0x70] sm:$0xff]  ;;  %v155_v29 = vld [vmem:[#allocation3 + $0x48] sm:$0xff] }
  0x1f   :  { %334 = vmatpush.bf16.msra.mxu0 %v789_v42  ;;  %874 = vmatpush.bf16.msra.mxu3 %v789_v42  ;;  %v161_v21 = vld [vmem:[#allocation3 + $0x78] sm:$0xff]  ;;  %v163_v22 = vpack.c.bf16 %v149_v19, %v148_v18  ;;  %v624_v32 = vld [vmem:[%s1187_s2] sm:$0x7] }
  0x20   :  { %383 = vmatpush.bf16.msra.mxu1 %v1008_v43  ;;  %v169_v23 = vpack.c.bf16 %v161_v21, %v160_v20  ;;  %v153_v27 = vld [vmem:[#allocation3 + $0x38] sm:$0xff]  ;;  %v1035_v33 = vperm.slane %v624_v32, 0  ;;  %v1041_v40 = vperm.slane %v624_v32, 2 }
  0x21   :  { %432 = vmatpush.bf16.msra.mxu2 %v1010_v44  ;;  %v157_v30 = vld [vmem:[#allocation3 + $0x58] sm:$0xff] }
  0x23   :  { %335 = vmatpush.bf16.msra.mxu0 %v777_v51  ;;  %875 = vmatpush.bf16.msra.mxu3 %v777_v51 }
  0x24   :  { %384 = vmatpush.bf16.msra.mxu1 %v781_v52 }
  0x25   :  { %433 = vmatpush.bf16.msra.mxu2 %v1014_v53 }
  0x27   :  { %336 = vmatpush.bf16.msra.mxu0 %v765_v60  ;;  %876 = vmatpush.bf16.msra.mxu3 %v765_v60 }
  0x28   :  { %385 = vmatpush.bf16.msra.mxu1 %v769_v61 }
  0x29   :  { %434 = vmatpush.bf16.msra.mxu2 %v1017_v62 }
  0x2b   :  { %337 = vmatpush.bf16.msra.mxu0 %v753_v6  ;;  %877 = vmatpush.bf16.msra.mxu3 %v753_v6 }
  0x2c   :  { %386 = vmatpush.bf16.msra.mxu1 %v757_v12 }
  0x2d   :  { %435 = vmatpush.bf16.msra.mxu2 %v761_v13 }
  0x2e   :  { %338 = vmatmul.bf16.vlgmr.msra.gmra.mxu0 %v162_v14  ;;  %368 = vmatmul.bf16.vlgmr.msra.gmra.mxu3 %v168_v15 }
  0x2f   :  { %878 = vmatpush.bf16.msrb.mxu3 %v984_v7  ;;  %387 = vmatmul.bf16.vlgmr.msra.gmra.mxu1 %v162_v14  ;;  %v150_v7 = vld [vmem:[#allocation3 + $0x20] sm:$0xff] }
  0x30   :  { %436 = vmatmul.bf16.vlgmr.msra.gmra.mxu2 %v162_v14 }
  0x33   :  { %879 = vmatpush.bf16.msrb.mxu3 %v990_v16  ;;  %v151_v16 = vld [vmem:[#allocation3 + $0x28] sm:$0xff] }
  0x34   :  { %v164_v24 = vpack.c.bf16 %v151_v16, %v150_v7 }
  0x37   :  { %880 = vmatpush.bf16.msrb.mxu3 %v996_v25  ;;  %v152_v25 = vld [vmem:[#allocation3 + $0x30] sm:$0xff] }
  0x38   :  { %v165_v28 = vpack.c.bf16 %v153_v27, %v152_v25 }
  0x3b   :  { %881 = vmatpush.bf16.msrb.mxu3 %v1002_v34  ;;  %v1037_v34 = vperm.slane %v624_v32, 1 }
  0x3e   :  { %343 = vmatmul.bf16.gmra.mxu0 %v163_v22  ;;  %373 = vmatmul.bf16.gmra.mxu3 %v169_v23 }
  0x3f   :  { %882 = vmatpush.bf16.msrb.mxu3 %v1008_v43  ;;  %392 = vmatmul.bf16.gmra.mxu1 %v163_v22 }
  0x40   :  { %441 = vmatmul.bf16.gmra.mxu2 %v163_v22 }
  0x43   :  { %883 = vmatpush.bf16.msrb.mxu3 %v781_v52 }
  0x47   :  { %884 = vmatpush.bf16.msrb.mxu3 %v769_v61 }
  0x4b   :  { %885 = vmatpush.bf16.msrb.mxu3 %v757_v12 }
  0x4e   :  { %348 = vmatmul.bf16.gmra.mxu0 %v164_v24  ;;  %417 = vmatmul.bf16.vlgmr.msrb.gmra.mxu3 %v168_v15 }
  0x4f   :  { %886 = vmatpush.bf16.msra.mxu3 %v986_v8  ;;  %397 = vmatmul.bf16.gmra.mxu1 %v164_v24  ;;  %v154_v8 = vld [vmem:[#allocation3 + $0x40] sm:$0xff] }
  0x50   :  { %446 = vmatmul.bf16.gmra.mxu2 %v164_v24 }
  0x53   :  { %887 = vmatpush.bf16.msra.mxu3 %v992_v17  ;;  %v166_v17 = vpack.c.bf16 %v155_v29, %v154_v8 }
  0x57   :  { %888 = vmatpush.bf16.msra.mxu3 %v998_v26  ;;  %v156_v26 = vld [vmem:[#allocation3 + $0x50] sm:$0xff] }
  0x58   :  { %v167_v31 = vpack.c.bf16 %v157_v30, %v156_v26 }
  0x5b   :  { %889 = vmatpush.bf16.msra.mxu3 %v1004_v35 }
  0x5e   :  { %353 = vmatmul.bf16.gmra.mxu0 %v165_v28  ;;  %422 = vmatmul.bf16.gmra.mxu3 %v169_v23 }
  0x5f   :  { %890 = vmatpush.bf16.msra.mxu3 %v1010_v44  ;;  %402 = vmatmul.bf16.gmra.mxu1 %v165_v28 }
  0x60   :  { %451 = vmatmul.bf16.gmra.mxu2 %v165_v28 }
  0x63   :  { %891 = vmatpush.bf16.msra.mxu3 %v1014_v53 }
  0x67   :  { %892 = vmatpush.bf16.msra.mxu3 %v1017_v62 }
  0x6b   :  { %893 = vmatpush.bf16.msra.mxu3 %v761_v13 }
  0x6e   :  { %358 = vmatmul.bf16.gmra.mxu0 %v166_v17  ;;  %466 = vmatmul.bf16.vlgmr.msra.gmra.mxu3 %v168_v15 }
  0x6f   :  { %407 = vmatmul.bf16.gmra.mxu1 %v166_v17 }
  0x70   :  { %456 = vmatmul.bf16.gmra.mxu2 %v166_v17 }
  0x7e   :  { %363 = vmatmul.bf16.gmra.mxu0 %v167_v31  ;;  %471 = vmatmul.bf16.gmra.mxu3 %v169_v23 }
  0x7f   :  { %412 = vmatmul.bf16.gmra.mxu1 %v167_v31 }
  0x80   :  { %461 = vmatmul.bf16.gmra.mxu2 %v167_v31 }
  0xab   :  { %v339_v35 = vpop.f32.mrf.mxu0 }
  0xac   :  { %v632_v36 = vadd.f32 %v1035_v33, %v339_v35  ;;  %v388_v37 = vpop.f32.mrf.mxu1 }
  0xad   :  { %v633_v38 = vadd.f32 %v1037_v34, %v388_v37 }
  0xaf   :  { %v680_v39 = vpack.c.bf16 %v633_v38, %v632_v36 }
  0xb1   :  { %712 = vst [vmem:[%s1188_s3] sm:$0xff] %v680_v39  ;;  %v369_v41 = vpop.f32.mrf.mxu3 }
  0xb2   :  { %v668_v18 = vadd.f32 %v1035_v33, %v369_v41 }
  0xb3   :  { %v437_v42 = vpop.f32.mrf.mxu2  ;;  %v341_v44 = vpop.f32.mrf.mxu0 }
  0xb4   :  { %v634_v43 = vadd.f32 %v1041_v40, %v437_v42  ;;  %v635_v45 = vadd.f32 %v1035_v33, %v341_v44  ;;  %v390_v46 = vpop.f32.mrf.mxu1 }
  0xb5   :  { %v636_v48 = vadd.f32 %v1037_v34, %v390_v46 }
  0xb6   :  { %v681_v47 = vpack.c.bf16 %v634_v43, %v634_v43 }
  0xb7   :  { %v682_v49 = vpack.c.bf16 %v636_v48, %v635_v45 }
  0xb8   :  { %713 = vst [vmem:[%s1188_s3 + $0x8] sm:$0xf] %v681_v47 }
  0xb9   :  { %714 = vst [vmem:[%s1188_s3 + $0xc] sm:$0xff] %v682_v49  ;;  %v371_v50 = vpop.f32.mrf.mxu3 }
  0xba   :  { %v671_v8 = vadd.f32 %v1035_v33, %v371_v50 }
  0xbb   :  { %v439_v51 = vpop.f32.mrf.mxu2  ;;  %v344_v53 = vpop.f32.mrf.mxu0 }
  0xbc   :  { %v637_v52 = vadd.f32 %v1041_v40, %v439_v51  ;;  %v638_v54 = vadd.f32 %v1035_v33, %v344_v53  ;;  %v393_v55 = vpop.f32.mrf.mxu1 }
  0xbd   :  { %v639_v57 = vadd.f32 %v1037_v34, %v393_v55 }
  0xbe   :  { %v683_v56 = vpack.c.bf16 %v637_v52, %v637_v52 }
  0xbf   :  { %v684_v58 = vpack.c.bf16 %v639_v57, %v638_v54 }
  0xc0   :  { %715 = vst [vmem:[%s1188_s3 + $0x14] sm:$0xf] %v683_v56 }
  0xc1   :  { %716 = vst [vmem:[%s1188_s3 + $0x18] sm:$0xff] %v684_v58  ;;  %v374_v59 = vpop.f32.mrf.mxu3 }
  0xc2   :  { %v674_v41 = vadd.f32 %v1035_v33, %v374_v59 }
  0xc3   :  { %v442_v60 = vpop.f32.mrf.mxu2  ;;  %v346_v62 = vpop.f32.mrf.mxu0 }
  0xc4   :  { %v640_v61 = vadd.f32 %v1041_v40, %v442_v60  ;;  %v641_v63 = vadd.f32 %v1035_v33, %v346_v62  ;;  %v395_v0 = vpop.f32.mrf.mxu1 }
  0xc5   :  { %v642_v2 = vadd.f32 %v1037_v34, %v395_v0 }
  0xc6   :  { %v685_v1 = vpack.c.bf16 %v640_v61, %v640_v61 }
  0xc7   :  { %v686_v3 = vpack.c.bf16 %v642_v2, %v641_v63 }
  0xc8   :  { %717 = vst [vmem:[%s1188_s3 + $0x20] sm:$0xf] %v685_v1 }
  0xc9   :  { %718 = vst [vmem:[%s1188_s3 + $0x24] sm:$0xff] %v686_v3  ;;  %v376_v4 = vpop.f32.mrf.mxu3 }
  0xca   :  { %v677_v53 = vadd.f32 %v1035_v33, %v376_v4 }
  0xcb   :  { %v444_v5 = vpop.f32.mrf.mxu2  ;;  %v349_v9 = vpop.f32.mrf.mxu0 }
  0xcc   :  { %v643_v6 = vadd.f32 %v1041_v40, %v444_v5  ;;  %v644_v10 = vadd.f32 %v1035_v33, %v349_v9  ;;  %v398_v11 = vpop.f32.mrf.mxu1 }
  0xcd   :  { %v645_v13 = vadd.f32 %v1037_v34, %v398_v11 }
  0xce   :  { %v687_v12 = vpack.c.bf16 %v643_v6, %v643_v6 }
  0xcf   :  { %v688_v14 = vpack.c.bf16 %v645_v13, %v644_v10 }
  0xd0   :  { %719 = vst [vmem:[%s1188_s3 + $0x2c] sm:$0xf] %v687_v12 }
  0xd1   :  { %720 = vst [vmem:[%s1188_s3 + $0x30] sm:$0xff] %v688_v14  ;;  %v418_v15 = vpop.f32.mrf.mxu3 }
  0xd2   :  { %v669_v19 = vadd.f32 %v1037_v34, %v418_v15 }
  0xd3   :  { %v447_v20 = vpop.f32.mrf.mxu2  ;;  %v351_v22 = vpop.f32.mrf.mxu0 }
  0xd4   :  { %v646_v21 = vadd.f32 %v1041_v40, %v447_v20  ;;  %v704_v23 = vpack.c.bf16 %v669_v19, %v668_v18  ;;  %v647_v7 = vadd.f32 %v1035_v33, %v351_v22  ;;  %v400_v16 = vpop.f32.mrf.mxu1 }
  0xd5   :  { %v648_v25 = vadd.f32 %v1037_v34, %v400_v16 }
  0xd6   :  { %v689_v24 = vpack.c.bf16 %v646_v21, %v646_v21  ;;  %736 = vst [vmem:[%s1188_s3 + $0x90] sm:$0xff] %v704_v23 }
  0xd7   :  { %v690_v27 = vpack.c.bf16 %v648_v25, %v647_v7 }
  0xd8   :  { %721 = vst [vmem:[%s1188_s3 + $0x38] sm:$0xf] %v689_v24 }
  0xd9   :  { %722 = vst [vmem:[%s1188_s3 + $0x3c] sm:$0xff] %v690_v27  ;;  %v420_v28 = vpop.f32.mrf.mxu3 }
  0xda   :  { %v672_v29 = vadd.f32 %v1037_v34, %v420_v28 }
  0xdb   :  { %v449_v17 = vpop.f32.mrf.mxu2  ;;  %v354_v30 = vpop.f32.mrf.mxu0 }
  0xdc   :  { %v649_v26 = vadd.f32 %v1041_v40, %v449_v17  ;;  %v706_v31 = vpack.c.bf16 %v672_v29, %v671_v8  ;;  %v650_v32 = vadd.f32 %v1035_v33, %v354_v30  ;;  %v403_v35 = vpop.f32.mrf.mxu1 }
  0xdd   :  { %v651_v37 = vadd.f32 %v1037_v34, %v403_v35 }
  0xde   :  { %v691_v36 = vpack.c.bf16 %v649_v26, %v649_v26  ;;  %738 = vst [vmem:[%s1188_s3 + $0x9c] sm:$0xff] %v706_v31 }
  0xdf   :  { %v692_v38 = vpack.c.bf16 %v651_v37, %v650_v32 }
  0xe0   :  { %723 = vst [vmem:[%s1188_s3 + $0x44] sm:$0xf] %v691_v36 }
  0xe1   :  { %724 = vst [vmem:[%s1188_s3 + $0x48] sm:$0xff] %v692_v38  ;;  %v423_v39 = vpop.f32.mrf.mxu3 }
  0xe2   :  { %v675_v42 = vadd.f32 %v1037_v34, %v423_v39 }
  0xe3   :  { %v452_v43 = vpop.f32.mrf.mxu2  ;;  %v356_v45 = vpop.f32.mrf.mxu0 }
  0xe4   :  { %v652_v44 = vadd.f32 %v1041_v40, %v452_v43  ;;  %v708_v46 = vpack.c.bf16 %v675_v42, %v674_v41  ;;  %v653_v47 = vadd.f32 %v1035_v33, %v356_v45  ;;  %v405_v48 = vpop.f32.mrf.mxu1 }
  0xe5   :  { %v654_v50 = vadd.f32 %v1037_v34, %v405_v48 }
  0xe6   :  { %v693_v49 = vpack.c.bf16 %v652_v44, %v652_v44  ;;  %740 = vst [vmem:[%s1188_s3 + $0xa8] sm:$0xff] %v708_v46 }
  0xe7   :  { %v694_v51 = vpack.c.bf16 %v654_v50, %v653_v47 }
  0xe8   :  { %725 = vst [vmem:[%s1188_s3 + $0x50] sm:$0xf] %v693_v49 }
  0xe9   :  { %726 = vst [vmem:[%s1188_s3 + $0x54] sm:$0xff] %v694_v51  ;;  %v425_v52 = vpop.f32.mrf.mxu3 }
  0xea   :  { %v678_v54 = vadd.f32 %v1037_v34, %v425_v52 }
  0xeb   :  { %v454_v55 = vpop.f32.mrf.mxu2  ;;  %v359_v57 = vpop.f32.mrf.mxu0 }
  0xec   :  { %v655_v56 = vadd.f32 %v1041_v40, %v454_v55  ;;  %v710_v58 = vpack.c.bf16 %v678_v54, %v677_v53  ;;  %v656_v59 = vadd.f32 %v1035_v33, %v359_v57  ;;  %v408_v60 = vpop.f32.mrf.mxu1 }
  0xed   :  { %v657_v62 = vadd.f32 %v1037_v34, %v408_v60 }
  0xee   :  { %v695_v61 = vpack.c.bf16 %v655_v56, %v655_v56  ;;  %742 = vst [vmem:[%s1188_s3 + $0xb4] sm:$0xff] %v710_v58 }
  0xef   :  { %v696_v63 = vpack.c.bf16 %v657_v62, %v656_v59 }
  0xf0   :  { %727 = vst [vmem:[%s1188_s3 + $0x5c] sm:$0xf] %v695_v61 }
  0xf1   :  { %728 = vst [vmem:[%s1188_s3 + $0x60] sm:$0xff] %v696_v63  ;;  %v467_v0 = vpop.f32.mrf.mxu3 }
  0xf2   :  { %v670_v2 = vadd.f32 %v1041_v40, %v467_v0 }
  0xf3   :  { %v457_v1 = vpop.f32.mrf.mxu2  ;;  %v361_v4 = vpop.f32.mrf.mxu0 }
  0xf4   :  { %v658_v3 = vadd.f32 %v1041_v40, %v457_v1  ;;  %v705_v5 = vpack.c.bf16 %v670_v2, %v670_v2  ;;  %v659_v6 = vadd.f32 %v1035_v33, %v361_v4  ;;  %v410_v9 = vpop.f32.mrf.mxu1 }
  0xf5   :  { %v660_v11 = vadd.f32 %v1037_v34, %v410_v9 }
  0xf6   :  { %v697_v10 = vpack.c.bf16 %v658_v3, %v658_v3  ;;  %737 = vst [vmem:[%s1188_s3 + $0x98] sm:$0xf] %v705_v5 }
  0xf7   :  { %v698_v12 = vpack.c.bf16 %v660_v11, %v659_v6 }
  0xf8   :  { %729 = vst [vmem:[%s1188_s3 + $0x68] sm:$0xf] %v697_v10 }
  0xf9   :  { %730 = vst [vmem:[%s1188_s3 + $0x6c] sm:$0xff] %v698_v12  ;;  %v469_v13 = vpop.f32.mrf.mxu3 }
  0xfa   :  { %v673_v15 = vadd.f32 %v1041_v40, %v469_v13 }
  0xfb   :  { %v459_v14 = vpop.f32.mrf.mxu2  ;;  %v364_v19 = vpop.f32.mrf.mxu0 }
  0xfc   :  { %v661_v18 = vadd.f32 %v1041_v40, %v459_v14  ;;  %v707_v20 = vpack.c.bf16 %v673_v15, %v673_v15  ;;  %v662_v21 = vadd.f32 %v1035_v33, %v364_v19  ;;  %v413_v22 = vpop.f32.mrf.mxu1 }
  0xfd   :  { %v663_v7 = vadd.f32 %v1037_v34, %v413_v22 }
  0xfe   :  { %v699_v23 = vpack.c.bf16 %v661_v18, %v661_v18  ;;  %739 = vst [vmem:[%s1188_s3 + $0xa4] sm:$0xf] %v707_v20 }
  0xff   :  { %v700_v16 = vpack.c.bf16 %v663_v7, %v662_v21 }
 0x100   :  { %731 = vst [vmem:[%s1188_s3 + $0x74] sm:$0xf] %v699_v23 }
 0x101   :  { %732 = vst [vmem:[%s1188_s3 + $0x78] sm:$0xff] %v700_v16  ;;  %v472_v24 = vpop.f32.mrf.mxu3 }
 0x102   :  { %v676_v27 = vadd.f32 %v1041_v40, %v472_v24 }
 0x103   :  { %v462_v25 = vpop.f32.mrf.mxu2  ;;  %v366_v8 = vpop.f32.mrf.mxu0 }
 0x104   :  { %v664_v28 = vadd.f32 %v1041_v40, %v462_v25  ;;  %v709_v29 = vpack.c.bf16 %v676_v27, %v676_v27  ;;  %v665_v17 = vadd.f32 %v1035_v33, %v366_v8  ;;  %v415_v26 = vpop.f32.mrf.mxu1 }
 0x105   :  { %v666_v31 = vadd.f32 %v1037_v34, %v415_v26 }
 0x106   :  { %v701_v30 = vpack.c.bf16 %v664_v28, %v664_v28  ;;  %741 = vst [vmem:[%s1188_s3 + $0xb0] sm:$0xf] %v709_v29 }
 0x107   :  { %v702_v32 = vpack.c.bf16 %v666_v31, %v665_v17 }
 0x108   :  { %733 = vst [vmem:[%s1188_s3 + $0x80] sm:$0xf] %v701_v30 }
 0x109   :  { %734 = vst [vmem:[%s1188_s3 + $0x84] sm:$0xff] %v702_v32  ;;  %v474_v35 = vpop.f32.mrf.mxu3 }
 0x10a   :  { %v679_v33 = vadd.f32 %v1041_v40, %v474_v35 }
 0x10b   :  { %v464_v36 = vpop.f32.mrf.mxu2 }
 0x10c   :  { %v667_v37 = vadd.f32 %v1041_v40, %v464_v36  ;;  %v711_v34 = vpack.c.bf16 %v679_v33, %v679_v33 }
 0x10e   :  { %v703_v38 = vpack.c.bf16 %v667_v37, %v667_v37  ;;  %743 = vst [vmem:[%s1188_s3 + $0xbc] sm:$0xf] %v711_v34 }
 0x110   :  { %735 = vst [vmem:[%s1188_s3 + $0x8c] sm:$0xf] %v703_v38 }
 0x111   :  { %748 = vsyncpa [#allocation4], 1 }
 0x112   :  { %749 = vsyncpa [#allocation6], 1 }

</bundles_post_ra>
